<compile_context>
chip_gen: v6e
topology: v6e:2x2x1
jax: 0.10.0
libtpu: 0.0.40
codegen_flags: <defaults>
</compile_context>

<pallas_src>
import functools

import jax
import jax.numpy as jnp
from jax.experimental import pallas as pl
from jax.experimental.pallas import tpu as pltpu


def _make_mlp_kernel(num_layers):
    """Kernel body for a fixed number of hidden->hidden layers."""

    def kernel(*refs):
        x_ref = refs[0]                        # [1, B]   batch on lanes
        w1_ref = refs[1]                       # [H, 1]   fc1.weight ([out, in])
        w2_refs = refs[2:2 + num_layers]       # [H, H]   fc2[i].weight ([out, in])
        w3t_ref = refs[2 + num_layers]         # [H, 1]   fc3.weight.T
        b3_ref = refs[3 + num_layers]          # (1,) f32 scalar in SMEM
        o_ref = refs[4 + num_layers]           # [1, B]

        # fc1 (K=1 matmul) as a VPU broadcast multiply: [H,1] * [1,B] -> [H,B].
        h = jnp.tanh(w1_ref[...] * x_ref[...])

        # Hidden layers: [H,H] @ [H,B] on the MXU, batch stays on the lane axis.
        for w2_ref in w2_refs:
            h = jnp.tanh(
                jnp.dot(w2_ref[...], h, preferred_element_type=jnp.float32))

        # fc3 (M=1 matmul) as VPU multiply + sublane (XLU) reduction over H.
        y = jnp.sum(w3t_ref[...] * h, axis=0, keepdims=True)   # [1, B]
        o_ref[...] = (y + b3_ref[0]).astype(o_ref.dtype)

    return kernel


def _weight_spec(shape, single_buffer):
    """Resident weight BlockSpec (constant index_map => DMA'd once)."""
    index_map = lambda i: (0,) * len(shape)
    if single_buffer:
        # No pipelining needed for a constant block; one VMEM buffer suffices.
        return pl.BlockSpec(shape, index_map, pipeline_mode=pl.Buffered(1))
    return pl.BlockSpec(shape, index_map)


@functools.partial(jax.jit, static_argnames=("b_tile", "single_buffer_weights"))
def _net_forward_impl(x, w1, w2s, w3, b3, *, b_tile, single_buffer_weights):
    n = x.shape[0]
    h_dim = w1.shape[0]
    num_layers = len(w2s)

    # Batch-on-lanes layout: [N, 1] -> [1, N]. No explicit padding: Pallas
    # masks the ragged last block; stray lanes never mix and are sliced off.
    x_row = x.reshape(1, n).astype(jnp.float32)
    w3t = w3.reshape(1, h_dim).T.astype(jnp.float32)      # [H, 1]
    b3_s = b3.reshape(1).astype(jnp.float32)              # (1,) scalar in SMEM

    num_tiles = pl.cdiv(n, b_tile)

    in_specs = (
        [pl.BlockSpec((1, b_tile), lambda i: (0, i))]              # x (streamed)
        + [_weight_spec((h_dim, 1), single_buffer_weights)]        # w1 (resident)
        + [_weight_spec((h_dim, h_dim), single_buffer_weights)
           for _ in range(num_layers)]                             # w2 (resident)
        + [_weight_spec((h_dim, 1), single_buffer_weights)]        # w3t (resident)
        + [pl.BlockSpec(memory_space=pltpu.MemorySpace.SMEM)]      # b3 scalar
    )

    y_row = pl.pallas_call(
        _make_mlp_kernel(num_layers),
        out_shape=jax.ShapeDtypeStruct((1, n), jnp.float32),
        grid=(num_tiles,),
        in_specs=in_specs,
        out_specs=pl.BlockSpec((1, b_tile), lambda i: (0, i)),
        compiler_params=pltpu.CompilerParams(
            dimension_semantics=("parallel",)),
    )(x_row, w1, *w2s, w3t, b3_s)

    return y_row.reshape(n, 1)


def _device_caps():
    """Return (tensorcores_per_device, max batch-tile lanes) for this TPU."""
    kind = ""
    try:
        kind = jax.devices()[0].device_kind.lower()
    except Exception:
        pass
    # v4 / v5p / v7x expose 2 TensorCores per device (megacore); v5e/v6e one.
    dual_tc = ("v4" in kind) or ("v5p" in kind) or ("7" in kind)
    # v5e has a single vector-store slot: keep the live [H, b_tile] tile small.
    is_v5e = ("v5e" in kind) or ("v5 lite" in kind) or ("v5litepod" in kind)
    max_b = 512 if is_v5e else 1024
    return (2 if dual_tc else 1), max_b


def _choose_b_tile(n, n_tc, max_b):
    """Pick the batch tile (lanes per grid step)."""
    lane_chunks = pl.cdiv(max(n, 1), 128)      # 128-lane groups in the batch
    max_chunks = max(1, max_b // 128)
    if n_tc >= 2 and lane_chunks >= 2:
        # Guarantee >=2 grid tiles so the "parallel" batch axis shards across
        # both TensorCores (never a single tile covering the whole batch).
        chunks = min(max_chunks, max(1, lane_chunks // 2))
    else:
        # Single TC: fewest, fattest steps to amortize ~0.35us/step overhead.
        chunks = min(max_chunks, lane_chunks)
    return 128 * chunks


def net_forward(x, w1, w2s, w3, b3, *, b_tile=None):
    """Forward pass of Net as a single Pallas TPU kernel.

    Args (PyTorch [out, in] weight layout):
      x:   [N, 1] float32 input.
      w1:  [H, 1] fc1.weight.
      w2s: tuple of [H, H] fc2[i].weight.
      w3:  [1, H] fc3.weight.
      b3:  [1]    fc3.bias.
      b_tile: optional batch lanes per grid step (multiple of 128); default is
        chosen from the device generation (see _device_caps/_choose_b_tile).

    Returns:
      y: [N, 1] float32.
    """
    w2s = tuple(w2s)
    if b_tile is None:
        n_tc, max_b = _device_caps()
        b_tile = _choose_b_tile(x.shape[0], n_tc, max_b)
    assert b_tile % 128 == 0, "batch tile must be lane-aligned (multiple of 128)"

    try:
        return _net_forward_impl(x, w1, w2s, w3, b3,
                                 b_tile=b_tile, single_buffer_weights=True)
    except Exception:
        # Fallback for JAX versions that reject pl.Buffered(1) on a BlockSpec;
        # identical math, weights just keep the default pipeline buffering.
        return _net_forward_impl(x, w1, w2s, w3, b3,
                                 b_tile=b_tile, single_buffer_weights=False)


def reference_forward(x, w1, w2s, w3, b3):
    """Pure-JAX reference in full f32 precision (PyTorch weight layout)."""
    p = jax.lax.Precision.HIGHEST
    h = jnp.tanh(jnp.matmul(x, w1.T, precision=p))
    for w in w2s:
        h = jnp.tanh(jnp.matmul(h, w.T, precision=p))
    return jnp.matmul(h, w3.T, precision=p) + b3


if __name__ == "__main__":
    # Small deterministic configuration consistent with the module.
    N = 1000          # batch of scalar inputs (exercises the ragged last block)
    H = 32            # num_hidden_units
    NUM_LAYERS = 2    # num_layers

    key = jax.random.PRNGKey(0)
    k_x, k_w1, k_w2, k_w3, k_b3 = jax.random.split(key, 5)

    # Input: [N, 1], same as torch's Linear(1, ...) input convention.
    x = jax.random.normal(k_x, (N, 1), dtype=jnp.float32)

    # Weights in PyTorch's [out, in] layout.
    w1 = 0.5 * jax.random.normal(k_w1, (H, 1), dtype=jnp.float32)   # fc1.weight
    w2_list = []
    for _ in range(NUM_LAYERS):
        k_w2, sub = jax.random.split(k_w2)
        w2_list.append(0.2 * jax.random.normal(sub, (H, H), dtype=jnp.float32))
    w2s = tuple(w2_list)                                            # fc2 weights
    w3 = 0.3 * jax.random.normal(k_w3, (1, H), dtype=jnp.float32)   # fc3.weight
    b3 = 0.1 * jax.random.normal(k_b3, (1,), dtype=jnp.float32)     # fc3.bias

    y = net_forward(x, w1, w2s, w3, b3)          # b_tile auto-picked per device
    jax.block_until_ready(y)

    y_ref = reference_forward(x, w1, w2s, w3, b3)
    assert y.shape == (N, 1)
    # Tolerance covers MXU f32 matmul decomposition vs. the HIGHEST-precision
    # reference; real layout/transposition bugs produce O(1) errors.
    assert jnp.allclose(y, y_ref, atol=5e-3, rtol=5e-3), "mismatch vs reference"

    print("KERNEL_OK")
</pallas_src>

<mosaic_0001>
module attributes {stable_mosaic.version = 11 : i64} {
  func.func @kernel(%arg0: i32, %arg1: memref<1x1024xf32, #tpu.memory_space<vmem>>, %arg2: memref<32x1xf32, #tpu.memory_space<vmem>>, %arg3: memref<32x32xf32, #tpu.memory_space<vmem>>, %arg4: memref<32x32xf32, #tpu.memory_space<vmem>>, %arg5: memref<32x1xf32, #tpu.memory_space<vmem>>, %arg6: memref<1xf32, #tpu.memory_space<smem>>, %arg7: memref<1x1024xf32, #tpu.memory_space<vmem>>) attributes {dimension_semantics = [#tpu.dimension_semantics<parallel>], iteration_bounds = array<i64: 1>, scalar_prefetch = 0 : i64, scratch_operands = 0 : i64, tpu.core_type = #tpu.core_type<tc>, window_params = [{transform_indices = @transform_0, window_bounds = array<i64: 1, 1024>}, {pipeline_mode = #tpu.pipeline_mode<synchronous>, transform_indices = @transform_1, window_bounds = array<i64: 32, 1>}, {pipeline_mode = #tpu.pipeline_mode<synchronous>, transform_indices = @transform_2, window_bounds = array<i64: 32, 32>}, {pipeline_mode = #tpu.pipeline_mode<synchronous>, transform_indices = @transform_3, window_bounds = array<i64: 32, 32>}, {pipeline_mode = #tpu.pipeline_mode<synchronous>, transform_indices = @transform_4, window_bounds = array<i64: 32, 1>}, {transform_indices = @transform_5, window_bounds = array<i64: 1>}, {transform_indices = @transform_6, window_bounds = array<i64: 1, 1024>}]} {
    %c0 = arith.constant 0 : index
    %c0_0 = arith.constant 0 : index
    %0 = vector.load %arg2[%c0, %c0_0] : memref<32x1xf32, #tpu.memory_space<vmem>>, vector<32x1xf32>
    %c0_1 = arith.constant 0 : index
    %c0_2 = arith.constant 0 : index
    %1 = vector.load %arg1[%c0_1, %c0_2] : memref<1x1024xf32, #tpu.memory_space<vmem>>, vector<1x1024xf32>
    %2 = vector.broadcast %0 : vector<32x1xf32> to vector<32x1024xf32>
    %3 = vector.broadcast %1 : vector<1x1024xf32> to vector<32x1024xf32>
    %4 = arith.mulf %2, %3 : vector<32x1024xf32>
    %5 = math.tanh %4 : vector<32x1024xf32>
    %c0_3 = arith.constant 0 : index
    %c0_4 = arith.constant 0 : index
    %6 = vector.load %arg3[%c0_3, %c0_4] : memref<32x32xf32, #tpu.memory_space<vmem>>, vector<32x32xf32>
    %cst = arith.constant dense<0.000000e+00> : vector<32x1024xf32>
    %7 = tpu.matmul %6, %5, %cst {dimension_numbers = #tpu.dot_dimension_numbers<[1], [0], [0], [1], [0, 0, 1, 1], [], []>} : vector<32x32xf32>, vector<32x1024xf32>, vector<32x1024xf32> -> vector<32x1024xf32>
    %8 = math.tanh %7 : vector<32x1024xf32>
    %c0_5 = arith.constant 0 : index
    %c0_6 = arith.constant 0 : index
    %9 = vector.load %arg4[%c0_5, %c0_6] : memref<32x32xf32, #tpu.memory_space<vmem>>, vector<32x32xf32>
    %cst_7 = arith.constant dense<0.000000e+00> : vector<32x1024xf32>
    %10 = tpu.matmul %9, %8, %cst_7 {dimension_numbers = #tpu.dot_dimension_numbers<[1], [0], [0], [1], [0, 0, 1, 1], [], []>} : vector<32x32xf32>, vector<32x1024xf32>, vector<32x1024xf32> -> vector<32x1024xf32>
    %11 = math.tanh %10 : vector<32x1024xf32>
    %c0_8 = arith.constant 0 : index
    %c0_9 = arith.constant 0 : index
    %12 = vector.load %arg5[%c0_8, %c0_9] : memref<32x1xf32, #tpu.memory_space<vmem>>, vector<32x1xf32>
    %13 = vector.broadcast %12 : vector<32x1xf32> to vector<32x1024xf32>
    %14 = arith.mulf %13, %11 : vector<32x1024xf32>
    %cst_10 = arith.constant dense<0.000000e+00> : vector<1024xf32>
    %15 = vector.multi_reduction <add>, %14, %cst_10 [0] : vector<32x1024xf32> to vector<1024xf32>
    %16 = vector.shape_cast %15 : vector<1024xf32> to vector<1x1024xf32>
    %c0_11 = arith.constant 0 : index
    %17 = memref.load %arg6[%c0_11] : memref<1xf32, #tpu.memory_space<smem>>
    %18 = vector.broadcast %17 : f32 to vector<1x1024xf32>
    %19 = arith.addf %16, %18 : vector<1x1024xf32>
    %c0_12 = arith.constant 0 : index
    %c0_13 = arith.constant 0 : index
    %20 = vector.load %arg7[%c0_12, %c0_13] : memref<1x1024xf32, #tpu.memory_space<vmem>>, vector<1x1024xf32>
    tpu.vector_store %arg7[%c0_12, %c0_13], %19 {strides = array<i32>} : memref<1x1024xf32, #tpu.memory_space<vmem>>, vector<1x1024xf32>,
    return
  }
  func.func @transform_0(%arg0: i32) -> (i32, i32) {
    %c0_i32 = arith.constant 0 : i32
    %c0_i32_0 = arith.constant 0 : i32
    return %c0_i32, %arg0 : i32, i32
  }
  func.func @transform_1(%arg0: i32) -> (i32, i32) {
    %c0_i32 = arith.constant 0 : i32
    %c0_i32_0 = arith.constant 0 : i32
    %c0_i32_1 = arith.constant 0 : i32
    return %c0_i32, %c0_i32_0 : i32, i32
  }
  func.func @transform_2(%arg0: i32) -> (i32, i32) {
    %c0_i32 = arith.constant 0 : i32
    %c0_i32_0 = arith.constant 0 : i32
    %c0_i32_1 = arith.constant 0 : i32
    return %c0_i32, %c0_i32_0 : i32, i32
  }
  func.func @transform_3(%arg0: i32) -> (i32, i32) {
    %c0_i32 = arith.constant 0 : i32
    %c0_i32_0 = arith.constant 0 : i32
    %c0_i32_1 = arith.constant 0 : i32
    return %c0_i32, %c0_i32_0 : i32, i32
  }
  func.func @transform_4(%arg0: i32) -> (i32, i32) {
    %c0_i32 = arith.constant 0 : i32
    %c0_i32_0 = arith.constant 0 : i32
    %c0_i32_1 = arith.constant 0 : i32
    return %c0_i32, %c0_i32_0 : i32, i32
  }
  func.func @transform_5(%arg0: i32) -> i32 {
    %c0_i32 = arith.constant 0 : i32
    %c0_i32_0 = arith.constant 0 : i32
    return %c0_i32 : i32
  }
  func.func @transform_6(%arg0: i32) -> (i32, i32) {
    %c0_i32 = arith.constant 0 : i32
    %c0_i32_0 = arith.constant 0 : i32
    return %c0_i32, %arg0 : i32, i32
  }
}

module attributes {stable_mosaic.version = 11 : i64} {
  func.func @kernel(%arg0: i32, %arg1: memref<1x1024xf32, #tpu.memory_space<vmem>>, %arg2: memref<32x1xf32, #tpu.memory_space<vmem>>, %arg3: memref<32x32xf32, #tpu.memory_space<vmem>>, %arg4: memref<32x32xf32, #tpu.memory_space<vmem>>, %arg5: memref<32x1xf32, #tpu.memory_space<vmem>>, %arg6: memref<1xf32, #tpu.memory_space<smem>>, %arg7: memref<1x1024xf32, #tpu.memory_space<vmem>>) attributes {dimension_semantics = [#tpu.dimension_semantics<parallel>], iteration_bounds = array<i64: 1>, scalar_prefetch = 0 : i64, scratch_operands = 0 : i64, tpu.core_type = #tpu.core_type<tc>, window_params = [{transform_indices = @transform_0, window_bounds = array<i64: 1, 1024>}, {pipeline_mode = #tpu.pipeline_mode<synchronous>, transform_indices = @transform_1, window_bounds = array<i64: 32, 1>}, {pipeline_mode = #tpu.pipeline_mode<synchronous>, transform_indices = @transform_2, window_bounds = array<i64: 32, 32>}, {pipeline_mode = #tpu.pipeline_mode<synchronous>, transform_indices = @transform_3, window_bounds = array<i64: 32, 32>}, {pipeline_mode = #tpu.pipeline_mode<synchronous>, transform_indices = @transform_4, window_bounds = array<i64: 32, 1>}, {transform_indices = @transform_5, window_bounds = array<i64: 1>}, {transform_indices = @transform_6, window_bounds = array<i64: 1, 1024>}]} {
    %c0 = arith.constant 0 : index
    %c0_0 = arith.constant 0 : index
    %0 = vector.load %arg2[%c0, %c0_0] : memref<32x1xf32, #tpu.memory_space<vmem>>, vector<32x1xf32>
    %c0_1 = arith.constant 0 : index
    %c0_2 = arith.constant 0 : index
    %1 = vector.load %arg1[%c0_1, %c0_2] : memref<1x1024xf32, #tpu.memory_space<vmem>>, vector<1x1024xf32>
    %2 = vector.broadcast %0 : vector<32x1xf32> to vector<32x1024xf32>
    %3 = vector.broadcast %1 : vector<1x1024xf32> to vector<32x1024xf32>
    %4 = arith.mulf %2, %3 : vector<32x1024xf32>
    %5 = math.tanh %4 : vector<32x1024xf32>
    %c0_3 = arith.constant 0 : index
    %c0_4 = arith.constant 0 : index
    %6 = vector.load %arg3[%c0_3, %c0_4] : memref<32x32xf32, #tpu.memory_space<vmem>>, vector<32x32xf32>
    %cst = arith.constant dense<0.000000e+00> : vector<32x1024xf32>
    %7 = tpu.matmul %6, %5, %cst {dimension_numbers = #tpu.dot_dimension_numbers<[1], [0], [0], [1], [0, 0, 1, 1], [], []>} : vector<32x32xf32>, vector<32x1024xf32>, vector<32x1024xf32> -> vector<32x1024xf32>
    %8 = math.tanh %7 : vector<32x1024xf32>
    %c0_5 = arith.constant 0 : index
    %c0_6 = arith.constant 0 : index
    %9 = vector.load %arg4[%c0_5, %c0_6] : memref<32x32xf32, #tpu.memory_space<vmem>>, vector<32x32xf32>
    %cst_7 = arith.constant dense<0.000000e+00> : vector<32x1024xf32>
    %10 = tpu.matmul %9, %8, %cst_7 {dimension_numbers = #tpu.dot_dimension_numbers<[1], [0], [0], [1], [0, 0, 1, 1], [], []>} : vector<32x32xf32>, vector<32x1024xf32>, vector<32x1024xf32> -> vector<32x1024xf32>
    %11 = math.tanh %10 : vector<32x1024xf32>
    %c0_8 = arith.constant 0 : index
    %c0_9 = arith.constant 0 : index
    %12 = vector.load %arg5[%c0_8, %c0_9] : memref<32x1xf32, #tpu.memory_space<vmem>>, vector<32x1xf32>
    %13 = vector.broadcast %12 : vector<32x1xf32> to vector<32x1024xf32>
    %14 = arith.mulf %13, %11 : vector<32x1024xf32>
    %cst_10 = arith.constant dense<0.000000e+00> : vector<1024xf32>
    %15 = vector.multi_reduction <add>, %14, %cst_10 [0] : vector<32x1024xf32> to vector<1024xf32>
    %16 = vector.shape_cast %15 : vector<1024xf32> to vector<1x1024xf32>
    %c0_11 = arith.constant 0 : index
    %17 = memref.load %arg6[%c0_11] : memref<1xf32, #tpu.memory_space<smem>>
    %18 = vector.broadcast %17 : f32 to vector<1x1024xf32>
    %19 = arith.addf %16, %18 : vector<1x1024xf32>
    %c0_12 = arith.constant 0 : index
    %c0_13 = arith.constant 0 : index
    %20 = vector.load %arg7[%c0_12, %c0_13] : memref<1x1024xf32, #tpu.memory_space<vmem>>, vector<1x1024xf32>
    tpu.vector_store %arg7[%c0_12, %c0_13], %19 {strides = array<i32>} : memref<1x1024xf32, #tpu.memory_space<vmem>>, vector<1x1024xf32>,
    return
  }
  func.func @transform_0(%arg0: i32) -> (i32, i32) {
    %c0_i32 = arith.constant 0 : i32
    %c0_i32_0 = arith.constant 0 : i32
    return %c0_i32, %arg0 : i32, i32
  }
  func.func @transform_1(%arg0: i32) -> (i32, i32) {
    %c0_i32 = arith.constant 0 : i32
    %c0_i32_0 = arith.constant 0 : i32
    %c0_i32_1 = arith.constant 0 : i32
    return %c0_i32, %c0_i32_0 : i32, i32
  }
  func.func @transform_2(%arg0: i32) -> (i32, i32) {
    %c0_i32 = arith.constant 0 : i32
    %c0_i32_0 = arith.constant 0 : i32
    %c0_i32_1 = arith.constant 0 : i32
    return %c0_i32, %c0_i32_0 : i32, i32
  }
  func.func @transform_3(%arg0: i32) -> (i32, i32) {
    %c0_i32 = arith.constant 0 : i32
    %c0_i32_0 = arith.constant 0 : i32
    %c0_i32_1 = arith.constant 0 : i32
    return %c0_i32, %c0_i32_0 : i32, i32
  }
  func.func @transform_4(%arg0: i32) -> (i32, i32) {
    %c0_i32 = arith.constant 0 : i32
    %c0_i32_0 = arith.constant 0 : i32
    %c0_i32_1 = arith.constant 0 : i32
    return %c0_i32, %c0_i32_0 : i32, i32
  }
  func.func @transform_5(%arg0: i32) -> i32 {
    %c0_i32 = arith.constant 0 : i32
    %c0_i32_0 = arith.constant 0 : i32
    return %c0_i32 : i32
  }
  func.func @transform_6(%arg0: i32) -> (i32, i32) {
    %c0_i32 = arith.constant 0 : i32
    %c0_i32_0 = arith.constant 0 : i32
    return %c0_i32, %arg0 : i32, i32
  }
}

</mosaic_0001>

<bundles_post_ra>
// kernel: _net_forward_impl.1
= control target key start
LH: loop header
LB: loop body
LE: loop exit
PB: predicated region body
PF: predicated region fallthrough
CT: control target
= control target key end

     0   :  { %12 = vsyncpa [#allocation4], 0  ;;  %s1736_s0 = inlined_call_operand.hbm [shape: f32[1,1000], index: 0, kind: input, shape index: {}]   ;;  %s1737_s1 = inlined_call_operand.vmem [shape: f32[32,1], index: 1, kind: input, shape index: {}]   ;;  %s1738_s2 = inlined_call_operand.vmem [shape: f32[32,32], index: 2, kind: input, shape index: {}]   ;;  %s1739_s3 = inlined_call_operand.vmem [shape: f32[32,32], index: 3, kind: input, shape index: {}]   ;;  %s1740_s4 = inlined_call_operand.vmem [shape: f32[32,1], index: 4, kind: input, shape index: {}]   ;;  %s1741_s5 = inlined_call_operand.<no memory space> [shape: f32[1], index: 5, kind: input, shape index: {}]   ;;  %s1742_s6 = inlined_call_operand.hbm [shape: f32[1,1000], index: 6, kind: output, shape index: {}]  }
   0x1   :  { %13 = vsyncpa [#allocation5], 0  ;;  %s1463_s21 = smov [#allocation3]  }
   0x2   :  { %s20_s22 = sshll.u32 %s1463_s21, 4  ;;  %s21_s22 = int_to_ptr.vmem [resolvable:$true] %s20_s22 }
   0x3   :  { %s1427_s23 = scalar_lea.vmem %s21_s22, 128  ;;  %p1432_p1 = scmp.lt.s32.totalorder %s21_s22, %s21_s22 }
   0x4   :  { %p1428_p0 = scmp.ne.s32.totalorder %s21_s22, %s1427_s23  ;;  %p1433_p2 = scmp.lt.s32.totalorder %s1427_s23, %s1427_s23 }
   0x6   :  { %p1434_p3 = por %p1433_p2, %p1432_p1 }
   0x8   :  { %p1435_p4 = pnand %p1434_p3, %p1428_p0 }
   0xa   :  { %1438 = shalt.err (!%p1435_p4)
}
   0xb   :  { %23 = dma.hbm_to_vmem [thread:$0]  %s1736_s0, 128, %s21_s22, [#allocation4]  }
   0xc   :  { %1459 = dma.done.wait [#allocation4], 128  }
   0xd   :  { %1460 = vsyncadd [#allocation4], 4294967168  ;;  %v1464_v0 = vmov 0   ;;  %v40_v1 = vld [vmem:[%s1737_s1 + $0x18] sm:$0xff]  ;;  %v38_v2 = vld [vmem:[%s1737_s1 + $0x8] sm:$0xff]  ;;  %v1465_v9 = vmov 0.0   ;;  %v63_v10 = vlaneseq }
   0xe   :  { %1226 = vset.pattern.permute.xlu1 %v1464_v0  ;;  %1225 = vset.pattern.permute.xlu0 %v1464_v0  ;;  %v39_v3 = vld [vmem:[%s1737_s1 + $0x10] sm:$0xff]  ;;  %v37_v4 = vld [vmem:[%s1737_s1] sm:$0xff]  ;;  %v977_v6 = vld [vmem:[%s1740_s4 + $0x8] sm:$0xff]  ;;  %vm171_vm0 = vcmask 261120  }
   0xf   :  { %59 = vperm.xlu0 %1225, %v40_v1   ;;  %49 = vperm.xlu1 %1226, %v38_v2   ;;  %v976_v5 = vld [vmem:[%s1740_s4] sm:$0xff]  ;;  %v978_v7 = vld [vmem:[%s1740_s4 + $0x10] sm:$0xff]  ;;  %v979_v8 = vld [vmem:[%s1740_s4 + $0x18] sm:$0xff]  ;;  %v1532_v11 = vshrl.u32 %v63_v10, 7 }
  0x10   :  { %248 = vmatprep.mubr.f32.mxu0 %v1465_v9  ;;  %337 = vmatprep.mubr.f32.mxu1 %v1465_v9  ;;  %v41_v13 = vld [vmem:[#allocation3] sm:$0xff] }
  0x11   :  { %v81_v12 = vsub.s32 4, %v1532_v11  ;;  %v85_v14 = vsub.s32 5, %v1532_v11  ;;  %v89_v15 = vsub.s32 6, %v1532_v11  ;;  %v93_v16 = vsub.s32 7, %v1532_v11 }
  0x12   :  { %v65_v21 = vsub.s32 0, %v1532_v11  ;;  %v73_v23 = vsub.s32 2, %v1532_v11  ;;  %v69_v24 = vsub.s32 1, %v1532_v11  ;;  %v77_v34 = vsub.s32 3, %v1532_v11 }
  0x13   :  { %54 = vperm.xlu0 %1225, %v39_v3   ;;  %44 = vperm.xlu1 %1226, %v37_v4   ;;  %v1538_v17 = vrot.slane %v41_v13, %v81_v12  ;;  %v1540_v18 = vrot.slane %v41_v13, %v85_v14  ;;  %v1542_v20 = vrot.slane %v41_v13, %v89_v15 }
  0x14   :  { %v1545_v22 = vrot.slane %v41_v13, %v93_v16  ;;  %v66_v28 = vrot.slane %v41_v13, %v65_v21  ;;  %v74_v30 = vrot.slane %v41_v13, %v73_v23  ;;  %v70_v33 = vrot.slane %v41_v13, %v69_v24 }
  0x15   :  { %v78_v39 = vrot.slane %v41_v13, %v77_v34 }
  0x17   :  { %982 = vperm.xlu0 %1225, %v976_v5   ;;  %987 = vperm.xlu1 %1226, %v977_v6  }
  0x1b   :  { %992 = vperm.xlu0 %1225, %v978_v7   ;;  %997 = vperm.xlu1 %1226, %v979_v8  }
  0x8a   :  { %v60_v19 = vpop.permute.xlu0 %59  ;;  %v1553_v31 = vpop.permute.xlu1 %49 }
  0x8b   :  { %v131_v25 = vmul.f32 %v1538_v17, %v60_v19  ;;  %v132_v26 = vmul.f32 %v1540_v18, %v60_v19  ;;  %v133_v27 = vmul.f32 %v1542_v20, %v60_v19  ;;  %v134_v29 = vmul.f32 %v1545_v22, %v60_v19 }
  0x8c   :  { %v111_v35 = vmul.f32 %v66_v28, %v1553_v31  ;;  %v113_v36 = vmul.f32 %v74_v30, %v1553_v31  ;;  %v128_v38 = vmul.f32 %v70_v33, %v60_v19  ;;  %v130_v44 = vmul.f32 %v78_v39, %v60_v19 }
  0x8d   :  { %1227 = vtanh.f32 %v131_v25  ;;  %v127_v45 = vmul.f32 %v66_v28, %v60_v19  ;;  %v129_v46 = vmul.f32 %v74_v30, %v60_v19  ;;  %v112_v48 = vmul.f32 %v70_v33, %v1553_v31 }
  0x8e   :  { %v55_v32 = vpop.permute.xlu0 %54  ;;  %1229 = vtanh.f32 %v132_v26  ;;  %v45_v43 = vpop.permute.xlu1 %44  ;;  %v114_v49 = vmul.f32 %v78_v39, %v1553_v31  ;;  %v115_v57 = vmul.f32 %v1538_v17, %v1553_v31  ;;  %v116_v59 = vmul.f32 %v1540_v18, %v1553_v31 }
  0x8f   :  { %1231 = vtanh.f32 %v133_v27  ;;  %v119_v37 = vmul.f32 %v66_v28, %v55_v32  ;;  %v121_v40 = vmul.f32 %v74_v30, %v55_v32  ;;  %v120_v41 = vmul.f32 %v70_v33, %v55_v32 }
  0x90   :  { %1233 = vtanh.f32 %v134_v29  ;;  %v122_v42 = vmul.f32 %v78_v39, %v55_v32  ;;  %v103_v47 = vmul.f32 %v66_v28, %v45_v43  ;;  %v104_v51 = vmul.f32 %v70_v33, %v45_v43  ;;  %v168_v28 = vld [vmem:[%s1738_s2 + $0x8] sm:$0xff] }
  0x91   :  { %1235 = vtanh.f32 %v111_v35  ;;  %v106_v53 = vmul.f32 %v78_v39, %v45_v43  ;;  %v105_v55 = vmul.f32 %v74_v30, %v45_v43  ;;  %v124_v61 = vmul.f32 %v1540_v18, %v55_v32  ;;  %v169_v35 = vld [vmem:[%s1738_s2 + $0x10] sm:$0xff] }
  0x92   :  { %1237 = vtanh.f32 %v113_v36  ;;  %v126_v63 = vmul.f32 %v1545_v22, %v55_v32  ;;  %v123_v1 = vmul.f32 %v1538_v17, %v55_v32  ;;  %v125_v3 = vmul.f32 %v1542_v20, %v55_v32 }
  0x93   :  { %1239 = vtanh.f32 %v119_v37  ;;  %v117_v5 = vmul.f32 %v1542_v20, %v1553_v31  ;;  %v118_v7 = vmul.f32 %v1545_v22, %v1553_v31  ;;  %v108_v10 = vmul.f32 %v1540_v18, %v45_v43 }
  0x94   :  { %1241 = vtanh.f32 %v128_v38  ;;  %v110_v13 = vmul.f32 %v1545_v22, %v45_v43  ;;  %v107_v15 = vmul.f32 %v1538_v17, %v45_v43  ;;  %v109_v19 = vmul.f32 %v1542_v20, %v45_v43  ;;  %v167_v17 = vld [vmem:[%s1738_s2] sm:$0xff]  ;;  %v170_v38 = vld [vmem:[%s1738_s2 + $0x18] sm:$0xff] }
  0x95   :  { %1243 = vtanh.f32 %v121_v40 }
  0x96   :  { %1245 = vtanh.f32 %v120_v41 }
  0x97   :  { %1247 = vtanh.f32 %v122_v42 }
  0x98   :  { %1249 = vtanh.f32 %v130_v44 }
  0x99   :  { %1251 = vtanh.f32 %v127_v45 }
  0x9a   :  { %v1560_v50 = vpop.eup %1227  ;;  %1253 = vtanh.f32 %v129_v46 }
  0x9b   :  { %v1562_v52 = vpop.eup %1229  ;;  %1255 = vtanh.f32 %v103_v47 }
  0x9c   :  { %v1564_v54 = vpop.eup %1231  ;;  %1257 = vtanh.f32 %v112_v48 }
  0x9d   :  { %v1566_v56 = vpop.eup %1233  ;;  %1259 = vtanh.f32 %v114_v49 }
  0x9e   :  { %v1236_v58 = vpop.eup %1235  ;;  %1261 = vtanh.f32 %v104_v51 }
  0x9f   :  { %v1238_v60 = vpop.eup %1237  ;;  %1263 = vtanh.f32 %v106_v53 }
  0xa0   :  { %v1240_v62 = vpop.eup %1239  ;;  %1265 = vtanh.f32 %v105_v55 }
  0xa1   :  { %v1242_v0 = vpop.eup %1241  ;;  %1267 = vtanh.f32 %v115_v57 }
  0xa2   :  { %v1244_v2 = vpop.eup %1243  ;;  %1269 = vtanh.f32 %v116_v59  ;;  %208 = vmatprep.subr.mxu0 %v1242_v0 }
  0xa3   :  { %v1246_v4 = vpop.eup %1245  ;;  %1271 = vtanh.f32 %v124_v61 }
  0xa4   :  { %v1248_v6 = vpop.eup %1247  ;;  %1273 = vtanh.f32 %v126_v63 }
  0xa5   :  { %v1250_v8 = vpop.eup %1249  ;;  %1275 = vtanh.f32 %v123_v1 }
  0xa6   :  { %v1252_v12 = vpop.eup %1251  ;;  %1277 = vtanh.f32 %v125_v3  ;;  %297 = vmatprep.subr.mxu1 %v1250_v8 }
  0xa7   :  { %v1254_v14 = vpop.eup %1253  ;;  %1279 = vtanh.f32 %v117_v5  ;;  %209 = vmatpush1.msra.mxu0 %v1252_v12 }
  0xa8   :  { %v1256_v16 = vpop.eup %1255  ;;  %1281 = vtanh.f32 %v118_v7  ;;  %298 = vmatpush1.msra.mxu1 %v1254_v14  ;;  %210 = vmatprep.subr.mxu0 %v1246_v4 }
  0xa9   :  { %v1258_v21 = vpop.eup %1257  ;;  %1283 = vtanh.f32 %v108_v10  ;;  %299 = vmatprep.subr.mxu1 %v1248_v6  ;;  %211 = vmatpush1.msra.mxu0 %v1240_v62 }
  0xaa   :  { %v1260_v18 = vpop.eup %1259  ;;  %1285 = vtanh.f32 %v110_v13  ;;  %300 = vmatpush1.msra.mxu1 %v1244_v2  ;;  %212 = vmatprep.subr.mxu0 %v1258_v21 }
  0xab   :  { %v1262_v22 = vpop.eup %1261  ;;  %1287 = vtanh.f32 %v107_v15  ;;  %301 = vmatprep.subr.mxu1 %v1260_v18  ;;  %213 = vmatpush1.msra.mxu0 %v1236_v58 }
  0xac   :  { %v1264_v20 = vpop.eup %1263  ;;  %1289 = vtanh.f32 %v109_v19  ;;  %302 = vmatpush1.msra.mxu1 %v1238_v60  ;;  %214 = vmatprep.subr.mxu0 %v1262_v22 }
  0xad   :  { %v1266_v23 = vpop.eup %1265  ;;  %303 = vmatprep.subr.mxu1 %v1264_v20  ;;  %215 = vmatpush1.msra.mxu0 %v1256_v16 }
  0xae   :  { %v1268_v24 = vpop.eup %1267  ;;  %304 = vmatpush1.msra.mxu1 %v1266_v23  ;;  %1188 = vmatmul.mubr.msk.f32.vlgmr.msra.gmra.mxu0 %vm171_vm0, %v167_v17  ;;  %v1641_v23 = vld [vmem:[%s1739_s3] sm:$0xff] }
  0xaf   :  { %v1270_v25 = vpop.eup %1269  ;;  %1192 = vmatmul.mubr.msk.f32.vlgmr.msra.gmra.mxu1 %vm171_vm0, %v167_v17  ;;  %386 = vmatprep.subr.mxu0 %v1562_v52 }
  0xb0   :  { %v1272_v26 = vpop.eup %1271  ;;  %475 = vmatprep.subr.mxu1 %v1566_v56  ;;  %387 = vmatpush1.msra.mxu0 %v1560_v50 }
  0xb1   :  { %v1274_v27 = vpop.eup %1273  ;;  %476 = vmatpush1.msra.mxu1 %v1564_v54  ;;  %388 = vmatprep.subr.mxu0 %v1272_v26  ;;  %v573_v26 = vld [vmem:[%s1739_s3 + $0x8] sm:$0xff] }
  0xb2   :  { %v1276_v29 = vpop.eup %1275  ;;  %477 = vmatprep.subr.mxu1 %v1274_v27  ;;  %254 = vmatprep.mubr.f32.mxu0 %v1465_v9 }
  0xb3   :  { %v1278_v30 = vpop.eup %1277  ;;  %343 = vmatprep.mubr.f32.mxu1 %v1465_v9  ;;  %389 = vmatpush1.msra.mxu0 %v1276_v29 }
  0xb4   :  { %v1280_v31 = vpop.eup %1279  ;;  %478 = vmatpush1.msra.mxu1 %v1278_v30  ;;  %1189 = vmatmul.mubr.msk.f32.gmra.mxu0 %vm171_vm0, %v168_v28  ;;  %v574_v30 = vld [vmem:[%s1739_s3 + $0x10] sm:$0xff] }
  0xb5   :  { %v1282_v32 = vpop.eup %1281  ;;  %1193 = vmatmul.mubr.msk.f32.gmra.mxu1 %vm171_vm0, %v168_v28  ;;  %390 = vmatprep.subr.mxu0 %v1270_v25 }
  0xb6   :  { %v1284_v33 = vpop.eup %1283  ;;  %479 = vmatprep.subr.mxu1 %v1282_v32  ;;  %391 = vmatpush1.msra.mxu0 %v1268_v24 }
  0xb7   :  { %v1286_v34 = vpop.eup %1285  ;;  %480 = vmatpush1.msra.mxu1 %v1280_v31  ;;  %392 = vmatprep.subr.mxu0 %v1284_v33 }
  0xb8   :  { %v1288_v36 = vpop.eup %1287  ;;  %481 = vmatprep.subr.mxu1 %v1286_v34  ;;  %260 = vmatprep.mubr.f32.mxu0 %v1465_v9 }
  0xb9   :  { %v1290_v37 = vpop.eup %1289  ;;  %349 = vmatprep.mubr.f32.mxu1 %v1465_v9  ;;  %393 = vmatpush1.msra.mxu0 %v1288_v36 }
  0xba   :  { %482 = vmatpush1.msra.mxu1 %v1290_v37  ;;  %1190 = vmatmul.mubr.msk.f32.gmra.mxu0 %vm171_vm0, %v169_v35  ;;  %v575_v37 = vld [vmem:[%s1739_s3 + $0x18] sm:$0xff] }
  0xbb   :  { %1194 = vmatmul.mubr.msk.f32.gmra.mxu1 %vm171_vm0, %v169_v35  ;;  %266 = vmatprep.mubr.f32.mxu0 %v1465_v9 }
  0xbc   :  { %355 = vmatprep.mubr.f32.mxu1 %v1465_v9 }
  0xbe   :  { %1191 = vmatmul.mubr.msk.f32.gmra.mxu0 %vm171_vm0, %v170_v38 }
  0xbf   :  { %1195 = vmatmul.mubr.msk.f32.gmra.mxu1 %vm171_vm0, %v170_v38  ;;  %426 = vmatprep.mubr.f32.mxu0 %v1465_v9 }
  0xc0   :  { %515 = vmatprep.mubr.f32.mxu1 %v1465_v9 }
  0xc2   :  { %1196 = vmatmul.mubr.msk.f32.vlgmr.msra.gmra.mxu0 %vm171_vm0, %v167_v17 }
  0xc3   :  { %1200 = vmatmul.mubr.msk.f32.vlgmr.msra.gmra.mxu1 %vm171_vm0, %v167_v17  ;;  %432 = vmatprep.mubr.f32.mxu0 %v1465_v9 }
  0xc4   :  { %521 = vmatprep.mubr.f32.mxu1 %v1465_v9 }
  0xc6   :  { %1197 = vmatmul.mubr.msk.f32.gmra.mxu0 %vm171_vm0, %v168_v28 }
  0xc7   :  { %1201 = vmatmul.mubr.msk.f32.gmra.mxu1 %vm171_vm0, %v168_v28  ;;  %438 = vmatprep.mubr.f32.mxu0 %v1465_v9 }
  0xc8   :  { %527 = vmatprep.mubr.f32.mxu1 %v1465_v9 }
  0xca   :  { %1198 = vmatmul.mubr.msk.f32.gmra.mxu0 %vm171_vm0, %v169_v35 }
  0xcb   :  { %1202 = vmatmul.mubr.msk.f32.gmra.mxu1 %vm171_vm0, %v169_v35  ;;  %444 = vmatprep.mubr.f32.mxu0 %v1465_v9 }
  0xcc   :  { %533 = vmatprep.mubr.f32.mxu1 %v1465_v9 }
  0xce   :  { %1199 = vmatmul.mubr.msk.f32.gmra.mxu0 %vm171_vm0, %v170_v38 }
  0xcf   :  { %1203 = vmatmul.mubr.msk.f32.gmra.mxu1 %vm171_vm0, %v170_v38  ;;  %652 = vmatprep.mubr.f32.mxu0 %v1465_v9 }
  0xd0   :  { %741 = vmatprep.mubr.f32.mxu1 %v1465_v9 }
 0x16e   :  { %v250_v39 = vpop.f32.mrf.mxu0 }
 0x16f   :  { %v339_v40 = vpop.f32.mrf.mxu1  ;;  %1291 = vtanh.f32 %v250_v39 }
 0x170   :  { %v252_v41 = vpop.f32.mrf.mxu0 }
 0x171   :  { %v341_v42 = vpop.f32.mrf.mxu1  ;;  %1293 = vtanh.f32 %v252_v41 }
 0x174   :  { %v256_v43 = vpop.f32.mrf.mxu0 }
 0x175   :  { %v345_v44 = vpop.f32.mrf.mxu1  ;;  %1295 = vtanh.f32 %v256_v43 }
 0x176   :  { %v258_v45 = vpop.f32.mrf.mxu0 }
 0x177   :  { %v347_v46 = vpop.f32.mrf.mxu1  ;;  %1297 = vtanh.f32 %v258_v45 }
 0x17a   :  { %v262_v47 = vpop.f32.mrf.mxu0 }
 0x17b   :  { %v351_v48 = vpop.f32.mrf.mxu1  ;;  %1299 = vtanh.f32 %v262_v47 }
 0x17c   :  { %v264_v49 = vpop.f32.mrf.mxu0  ;;  %v1292_v60 = vpop.eup %1291 }
 0x17d   :  { %v353_v50 = vpop.f32.mrf.mxu1  ;;  %1301 = vtanh.f32 %v264_v49 }
 0x17e   :  { %v268_v51 = vpop.f32.mrf.mxu0  ;;  %v1294_v62 = vpop.eup %1293 }
 0x17f   :  { %v357_v52 = vpop.f32.mrf.mxu1  ;;  %1303 = vtanh.f32 %v268_v51 }
 0x180   :  { %v270_v53 = vpop.f32.mrf.mxu0 }
 0x181   :  { %1305 = vtanh.f32 %v270_v53  ;;  %v359_v54 = vpop.f32.mrf.mxu1 }
 0x182   :  { %1307 = vtanh.f32 %v359_v54  ;;  %v1632_v55 = vpop.f32.mrf.mxu0  ;;  %v1296_v0 = vpop.eup %1295 }
 0x183   :  { %1309 = vtanh.f32 %v357_v52  ;;  %v1634_v56 = vpop.f32.mrf.mxu1 }
 0x184   :  { %1311 = vtanh.f32 %v353_v50  ;;  %v430_v57 = vpop.f32.mrf.mxu0  ;;  %v1298_v2 = vpop.eup %1297 }
 0x185   :  { %1313 = vtanh.f32 %v351_v48  ;;  %v1636_v58 = vpop.f32.mrf.mxu1 }
 0x186   :  { %1315 = vtanh.f32 %v347_v46  ;;  %v434_v59 = vpop.f32.mrf.mxu0 }
 0x187   :  { %1317 = vtanh.f32 %v345_v44  ;;  %v523_v61 = vpop.f32.mrf.mxu1 }
 0x188   :  { %1319 = vtanh.f32 %v341_v42  ;;  %v436_v63 = vpop.f32.mrf.mxu0  ;;  %v1300_v4 = vpop.eup %1299 }
 0x189   :  { %1321 = vtanh.f32 %v339_v40  ;;  %v525_v1 = vpop.f32.mrf.mxu1 }
 0x18a   :  { %v440_v3 = vpop.f32.mrf.mxu0  ;;  %v1302_v6 = vpop.eup %1301  ;;  %1323 = vtanh.f32 %v430_v57 }
 0x18b   :  { %v529_v5 = vpop.f32.mrf.mxu1  ;;  %1325 = vtanh.f32 %v434_v59 }
 0x18c   :  { %v442_v7 = vpop.f32.mrf.mxu0  ;;  %v1304_v8 = vpop.eup %1303 }
 0x18d   :  { %v531_v10 = vpop.f32.mrf.mxu1  ;;  %1327 = vtanh.f32 %v442_v7  ;;  %v1691_v7 = vpop.permute.xlu1 %987 }
 0x18e   :  { %v1306_v12 = vpop.eup %1305  ;;  %v446_v13 = vpop.f32.mrf.mxu0 }
 0x18f   :  { %v1308_v14 = vpop.eup %1307  ;;  %v535_v15 = vpop.f32.mrf.mxu1  ;;  %612 = vmatprep.subr.mxu0 %v1306_v12  ;;  %1329 = vtanh.f32 %v446_v13 }
 0x190   :  { %v1310_v16 = vpop.eup %1309  ;;  %701 = vmatprep.subr.mxu1 %v1308_v14  ;;  %v448_v19 = vpop.f32.mrf.mxu0  ;;  %613 = vmatpush1.msra.mxu0 %v1304_v8 }
 0x191   :  { %v1312_v21 = vpop.eup %1311  ;;  %1331 = vtanh.f32 %v448_v19  ;;  %v537_v18 = vpop.f32.mrf.mxu1  ;;  %702 = vmatpush1.msra.mxu1 %v1310_v16  ;;  %614 = vmatprep.subr.mxu0 %v1302_v6 }
 0x192   :  { %v1314_v22 = vpop.eup %1313  ;;  %1333 = vtanh.f32 %v537_v18  ;;  %703 = vmatprep.subr.mxu1 %v1312_v21  ;;  %615 = vmatpush1.msra.mxu0 %v1300_v4 }
 0x193   :  { %v1316_v17 = vpop.eup %1315  ;;  %1335 = vtanh.f32 %v535_v15  ;;  %704 = vmatpush1.msra.mxu1 %v1314_v22  ;;  %616 = vmatprep.subr.mxu0 %v1298_v2 }
 0x194   :  { %v1318_v20 = vpop.eup %1317  ;;  %1337 = vtanh.f32 %v531_v10  ;;  %705 = vmatprep.subr.mxu1 %v1316_v17  ;;  %617 = vmatpush1.msra.mxu0 %v1296_v0  ;;  %v1689_v0 = vpop.permute.xlu0 %982 }
 0x195   :  { %v1320_v24 = vpop.eup %1319  ;;  %1339 = vtanh.f32 %v440_v3  ;;  %706 = vmatpush1.msra.mxu1 %v1318_v20  ;;  %618 = vmatprep.subr.mxu0 %v1294_v62 }
 0x196   :  { %v1322_v25 = vpop.eup %1321  ;;  %1341 = vtanh.f32 %v529_v5  ;;  %707 = vmatprep.subr.mxu1 %v1320_v24  ;;  %619 = vmatpush1.msra.mxu0 %v1292_v60 }
 0x197   :  { %1343 = vtanh.f32 %v436_v63  ;;  %708 = vmatpush1.msra.mxu1 %v1322_v25  ;;  %1204 = vmatmul.mubr.msk.f32.vlgmr.msra.gmra.mxu0 %vm171_vm0, %v1641_v23  ;;  %v1324_v27 = vpop.eup %1323 }
 0x198   :  { %1345 = vtanh.f32 %v525_v1  ;;  %1208 = vmatmul.mubr.msk.f32.vlgmr.msra.gmra.mxu1 %vm171_vm0, %v1641_v23  ;;  %658 = vmatprep.mubr.f32.mxu0 %v1465_v9  ;;  %v1326_v28 = vpop.eup %1325  ;;  %v1693_v14 = vpop.permute.xlu0 %992 }
 0x199   :  { %1347 = vtanh.f32 %v523_v61  ;;  %747 = vmatprep.mubr.f32.mxu1 %v1465_v9 }
 0x19a   :  { %1349 = vtanh.f32 %v1636_v58  ;;  %v1328_v29 = vpop.eup %1327 }
 0x19b   :  { %1351 = vtanh.f32 %v1632_v55  ;;  %1205 = vmatmul.mubr.msk.f32.gmra.mxu0 %vm171_vm0, %v573_v26 }
 0x19c   :  { %1353 = vtanh.f32 %v1634_v56  ;;  %1209 = vmatmul.mubr.msk.f32.gmra.mxu1 %vm171_vm0, %v573_v26  ;;  %664 = vmatprep.mubr.f32.mxu0 %v1465_v9  ;;  %v1330_v31 = vpop.eup %1329 }
 0x19d   :  { %753 = vmatprep.mubr.f32.mxu1 %v1465_v9 }
 0x19e   :  { %v1332_v32 = vpop.eup %1331 }
 0x19f   :  { %v1334_v33 = vpop.eup %1333  ;;  %1206 = vmatmul.mubr.msk.f32.gmra.mxu0 %vm171_vm0, %v574_v30  ;;  %790 = vmatprep.subr.mxu0 %v1332_v32 }
 0x1a0   :  { %v1336_v34 = vpop.eup %1335  ;;  %1210 = vmatmul.mubr.msk.f32.gmra.mxu1 %vm171_vm0, %v574_v30  ;;  %879 = vmatprep.subr.mxu1 %v1334_v33 }
 0x1a1   :  { %v1338_v35 = vpop.eup %1337  ;;  %791 = vmatpush1.msra.mxu0 %v1330_v31  ;;  %880 = vmatpush1.msra.mxu1 %v1336_v34 }
 0x1a2   :  { %v1340_v36 = vpop.eup %1339  ;;  %792 = vmatprep.subr.mxu0 %v1328_v29  ;;  %881 = vmatprep.subr.mxu1 %v1338_v35  ;;  %v1703_v29 = vpop.permute.xlu1 %997 }
 0x1a3   :  { %v1342_v38 = vpop.eup %1341  ;;  %670 = vmatprep.mubr.f32.mxu0 %v1465_v9  ;;  %759 = vmatprep.mubr.f32.mxu1 %v1465_v9 }
 0x1a4   :  { %v1344_v39 = vpop.eup %1343  ;;  %793 = vmatpush1.msra.mxu0 %v1340_v36  ;;  %882 = vmatpush1.msra.mxu1 %v1342_v38 }
 0x1a5   :  { %v1346_v40 = vpop.eup %1345  ;;  %1207 = vmatmul.mubr.msk.f32.gmra.mxu0 %vm171_vm0, %v575_v37  ;;  %1211 = vmatmul.mubr.msk.f32.gmra.mxu1 %vm171_vm0, %v575_v37 }
 0x1a6   :  { %v1348_v41 = vpop.eup %1347  ;;  %794 = vmatprep.subr.mxu0 %v1344_v39  ;;  %883 = vmatprep.subr.mxu1 %v1346_v40 }
 0x1a7   :  { %v1350_v42 = vpop.eup %1349  ;;  %795 = vmatpush1.msra.mxu0 %v1326_v28  ;;  %884 = vmatpush1.msra.mxu1 %v1348_v41 }
 0x1a8   :  { %v1352_v43 = vpop.eup %1351  ;;  %796 = vmatprep.subr.mxu0 %v1324_v27  ;;  %885 = vmatprep.subr.mxu1 %v1350_v42 }
 0x1a9   :  { %v1354_v44 = vpop.eup %1353  ;;  %797 = vmatpush1.msra.mxu0 %v1352_v43  ;;  %830 = vmatprep.mubr.f32.mxu0 %v1465_v9 }
 0x1aa   :  { %886 = vmatpush1.msra.mxu1 %v1354_v44  ;;  %919 = vmatprep.mubr.f32.mxu1 %v1465_v9 }
 0x1ab   :  { %1212 = vmatmul.mubr.msk.f32.vlgmr.msra.gmra.mxu0 %vm171_vm0, %v1641_v23  ;;  %1216 = vmatmul.mubr.msk.f32.vlgmr.msra.gmra.mxu1 %vm171_vm0, %v1641_v23 }
 0x1ac   :  { %836 = vmatprep.mubr.f32.mxu0 %v1465_v9  ;;  %925 = vmatprep.mubr.f32.mxu1 %v1465_v9 }
 0x1af   :  { %1213 = vmatmul.mubr.msk.f32.gmra.mxu0 %vm171_vm0, %v573_v26  ;;  %1217 = vmatmul.mubr.msk.f32.gmra.mxu1 %vm171_vm0, %v573_v26 }
 0x1b0   :  { %842 = vmatprep.mubr.f32.mxu0 %v1465_v9  ;;  %931 = vmatprep.mubr.f32.mxu1 %v1465_v9 }
 0x1b3   :  { %1214 = vmatmul.mubr.msk.f32.gmra.mxu0 %vm171_vm0, %v574_v30  ;;  %1218 = vmatmul.mubr.msk.f32.gmra.mxu1 %vm171_vm0, %v574_v30 }
 0x1b4   :  { %848 = vmatprep.mubr.f32.mxu0 %v1465_v9  ;;  %937 = vmatprep.mubr.f32.mxu1 %v1465_v9 }
 0x1b7   :  { %1215 = vmatmul.mubr.msk.f32.gmra.mxu0 %vm171_vm0, %v575_v37  ;;  %1219 = vmatmul.mubr.msk.f32.gmra.mxu1 %vm171_vm0, %v575_v37 }
 0x257   :  { %v654_v45 = vpop.f32.mrf.mxu0 }
 0x258   :  { %1355 = vtanh.f32 %v654_v45  ;;  %v743_v46 = vpop.f32.mrf.mxu1 }
 0x259   :  { %1357 = vtanh.f32 %v743_v46  ;;  %v656_v47 = vpop.f32.mrf.mxu0 }
 0x25a   :  { %1359 = vtanh.f32 %v656_v47  ;;  %v745_v48 = vpop.f32.mrf.mxu1 }
 0x25b   :  { %1361 = vtanh.f32 %v745_v48  ;;  %v660_v49 = vpop.f32.mrf.mxu0 }
 0x25c   :  { %1363 = vtanh.f32 %v660_v49  ;;  %v749_v50 = vpop.f32.mrf.mxu1 }
 0x25d   :  { %1365 = vtanh.f32 %v749_v50  ;;  %v662_v51 = vpop.f32.mrf.mxu0 }
 0x25e   :  { %1367 = vtanh.f32 %v662_v51  ;;  %v751_v52 = vpop.f32.mrf.mxu1 }
 0x25f   :  { %1369 = vtanh.f32 %v751_v52  ;;  %v666_v9 = vpop.f32.mrf.mxu0 }
 0x260   :  { %1371 = vtanh.f32 %v666_v9  ;;  %v755_v53 = vpop.f32.mrf.mxu1 }
 0x261   :  { %1373 = vtanh.f32 %v755_v53  ;;  %v668_v54 = vpop.f32.mrf.mxu0 }
 0x262   :  { %1375 = vtanh.f32 %v668_v54  ;;  %v757_v55 = vpop.f32.mrf.mxu1 }
 0x263   :  { %1377 = vtanh.f32 %v757_v55 }
 0x265   :  { %v1356_v56 = vpop.eup %1355  ;;  %v672_v57 = vpop.f32.mrf.mxu0 }
 0x266   :  { %v761_v58 = vpop.f32.mrf.mxu1  ;;  %v1358_v59 = vpop.eup %1357  ;;  %1379 = vtanh.f32 %v672_v57  ;;  %v1000_v17 = vmul.f32 %v1356_v56, %v1689_v0 }
 0x267   :  { %v1360_v60 = vpop.eup %1359  ;;  %1381 = vtanh.f32 %v761_v58  ;;  %v674_v61 = vpop.f32.mrf.mxu0  ;;  %v1002_v24 = vmul.f32 %v1358_v59, %v1689_v0 }
 0x268   :  { %v763_v62 = vpop.f32.mrf.mxu1  ;;  %v1362_v63 = vpop.eup %1361  ;;  %1383 = vtanh.f32 %v674_v61  ;;  %v1001_v30 = vmul.f32 %v1360_v60, %v1689_v0 }
 0x269   :  { %v1364_v1 = vpop.eup %1363  ;;  %1385 = vtanh.f32 %v763_v62  ;;  %v1003_v34 = vmul.f32 %v1362_v63, %v1689_v0 }
 0x26a   :  { %v1366_v2 = vpop.eup %1365  ;;  %v1008_v15 = vmul.f32 %v1364_v1, %v1691_v7 }
 0x26b   :  { %v1368_v3 = vpop.eup %1367  ;;  %v832_v4 = vpop.f32.mrf.mxu0  ;;  %v1010_v19 = vmul.f32 %v1366_v2, %v1691_v7 }
 0x26c   :  { %v921_v5 = vpop.f32.mrf.mxu1  ;;  %v1370_v6 = vpop.eup %1369  ;;  %1387 = vtanh.f32 %v832_v4  ;;  %v1009_v20 = vmul.f32 %v1368_v3, %v1691_v7  ;;  %v1032_v31 = vadd.f32 %v1008_v15, %v1000_v17 }
 0x26d   :  { %v1372_v8 = vpop.eup %1371  ;;  %1389 = vtanh.f32 %v921_v5  ;;  %v834_v10 = vpop.f32.mrf.mxu0  ;;  %v1011_v25 = vmul.f32 %v1370_v6, %v1691_v7  ;;  %v1050_v35 = vadd.f32 %v1010_v19, %v1002_v24 }
 0x26e   :  { %v923_v12 = vpop.f32.mrf.mxu1  ;;  %v1374_v13 = vpop.eup %1373  ;;  %1391 = vtanh.f32 %v834_v10  ;;  %v1016_v23 = vmul.f32 %v1372_v8, %v1693_v14  ;;  %v1041_v40 = vadd.f32 %v1009_v20, %v1001_v30 }
 0x26f   :  { %v1376_v16 = vpop.eup %1375  ;;  %1393 = vtanh.f32 %v923_v12  ;;  %v838_v21 = vpop.f32.mrf.mxu0  ;;  %v1018_v26 = vmul.f32 %v1374_v13, %v1693_v14  ;;  %v1059_v44 = vadd.f32 %v1011_v25, %v1003_v34 }
 0x270   :  { %v927_v18 = vpop.f32.mrf.mxu1  ;;  %v1378_v22 = vpop.eup %1377  ;;  %1395 = vtanh.f32 %v838_v21  ;;  %v1017_v32 = vmul.f32 %v1376_v16, %v1693_v14  ;;  %v1033_v41 = vadd.f32 %v1032_v31, %v1016_v23 }
 0x271   :  { %1397 = vtanh.f32 %v927_v18  ;;  %v840_v27 = vpop.f32.mrf.mxu0  ;;  %v1019_v36 = vmul.f32 %v1378_v22, %v1693_v14  ;;  %v1051_v45 = vadd.f32 %v1050_v35, %v1018_v26 }
 0x272   :  { %v929_v28 = vpop.f32.mrf.mxu1  ;;  %1399 = vtanh.f32 %v840_v27  ;;  %v1042_v50 = vadd.f32 %v1041_v40, %v1017_v32 }
 0x273   :  { %v1380_v33 = vpop.eup %1379  ;;  %1401 = vtanh.f32 %v929_v28  ;;  %v844_v37 = vpop.f32.mrf.mxu0  ;;  %v1060_v9 = vadd.f32 %v1059_v44, %v1019_v36 }
 0x274   :  { %v933_v38 = vpop.f32.mrf.mxu1  ;;  %v1382_v39 = vpop.eup %1381  ;;  %v1024_v42 = vmul.f32 %v1380_v33, %v1703_v29  ;;  %1403 = vtanh.f32 %v844_v37 }
 0x275   :  { %v1384_v43 = vpop.eup %1383  ;;  %v1026_v46 = vmul.f32 %v1382_v39, %v1703_v29  ;;  %1405 = vtanh.f32 %v933_v38  ;;  %v846_v47 = vpop.f32.mrf.mxu0 }
 0x276   :  { %v935_v48 = vpop.f32.mrf.mxu1  ;;  %v1386_v49 = vpop.eup %1385  ;;  %v1034_v51 = vadd.f32 %v1033_v41, %v1024_v42  ;;  %v1025_v52 = vmul.f32 %v1384_v43, %v1703_v29  ;;  %1407 = vtanh.f32 %v846_v47 }
 0x277   :  { %v1052_v53 = vadd.f32 %v1051_v45, %v1026_v46  ;;  %v1027_v54 = vmul.f32 %v1386_v49, %v1703_v29  ;;  %1409 = vtanh.f32 %v935_v48  ;;  %v850_v55 = vpop.f32.mrf.mxu0 }
 0x278   :  { %v939_v56 = vpop.f32.mrf.mxu1  ;;  %v1043_v57 = vadd.f32 %v1042_v50, %v1025_v52  ;;  %1411 = vtanh.f32 %v850_v55  ;;  %v1035_v63 = vrot.slane %v1034_v51, 4 }
 0x279   :  { %v1388_v58 = vpop.eup %1387  ;;  %v1061_v59 = vadd.f32 %v1060_v9, %v1027_v54  ;;  %1413 = vtanh.f32 %v939_v56  ;;  %v852_v60 = vpop.f32.mrf.mxu0  ;;  %v1053_v3 = vrot.slane %v1052_v53, 4 }
 0x27a   :  { %v941_v61 = vpop.f32.mrf.mxu1  ;;  %v1390_v62 = vpop.eup %1389  ;;  %v1044_v1 = vrot.slane %v1043_v57, 4  ;;  %1415 = vtanh.f32 %v852_v60  ;;  %v1036_v13 = vadd.f32 %v1035_v63, %v1034_v51  ;;  %v1004_v24 = vmul.f32 %v1388_v58, %v1689_v0 }
 0x27b   :  { %v1392_v2 = vpop.eup %1391  ;;  %v1062_v4 = vrot.slane %v1061_v59, 4  ;;  %1417 = vtanh.f32 %v941_v61  ;;  %v1054_v16 = vadd.f32 %v1053_v3, %v1052_v53  ;;  %v1006_v30 = vmul.f32 %v1390_v62, %v1689_v0 }
 0x27c   :  { %v1394_v5 = vpop.eup %1393  ;;  %v1045_v6 = vadd.f32 %v1044_v1, %v1043_v57  ;;  %v1037_v27 = vrot.slane %v1036_v13, 2  ;;  %v1005_v35 = vmul.f32 %v1392_v2, %v1689_v0 }
 0x27d   :  { %v1396_v8 = vpop.eup %1395  ;;  %v1063_v10 = vadd.f32 %v1062_v4, %v1061_v59  ;;  %v1055_v33 = vrot.slane %v1054_v16, 2  ;;  %v1007_v40 = vmul.f32 %v1394_v5, %v1689_v0  ;;  %v1466_v4 = vmov 1966171168  }
 0x27e   :  { %v1398_v12 = vpop.eup %1397  ;;  %v1012_v21 = vmul.f32 %v1396_v8, %v1691_v7  ;;  %v1046_v18 = vrot.slane %v1045_v6, 2  ;;  %v1038_v47 = vadd.f32 %v1037_v27, %v1036_v13  ;;  %v1127_v5 = vunpack.c.l.s4 %v1466_v4 }
 0x27f   :  { %v1400_v15 = vpop.eup %1399  ;;  %v1014_v17 = vmul.f32 %v1398_v12, %v1691_v7  ;;  %v1064_v20 = vrot.slane %v1063_v10, 2  ;;  %v1056_v52 = vadd.f32 %v1055_v33, %v1054_v16 }
 0x280   :  { %v1402_v19 = vpop.eup %1401  ;;  %v1013_v25 = vmul.f32 %v1400_v15, %v1691_v7  ;;  %v1068_v36 = vadd.f32 %v1012_v21, %v1004_v24  ;;  %v1047_v38 = vadd.f32 %v1046_v18, %v1045_v6  ;;  %v1039_v63 = vrot.slane %v1038_v47, 1 }
 0x281   :  { %v1404_v22 = vpop.eup %1403  ;;  %v1015_v31 = vmul.f32 %v1402_v19, %v1691_v7  ;;  %v1086_v41 = vadd.f32 %v1014_v17, %v1006_v30  ;;  %v1065_v43 = vadd.f32 %v1064_v20, %v1063_v10  ;;  %v1057_v1 = vrot.slane %v1056_v52, 1 }
 0x282   :  { %v1406_v23 = vpop.eup %1405  ;;  %v1020_v26 = vmul.f32 %v1404_v22, %v1693_v14  ;;  %v1077_v45 = vadd.f32 %v1013_v25, %v1005_v35  ;;  %v1048_v55 = vrot.slane %v1047_v38, 1  ;;  %v1040_v19 = vadd.f32 %v1039_v63, %v1038_v47 }
 0x283   :  { %v1408_v28 = vpop.eup %1407  ;;  %v1022_v32 = vmul.f32 %v1406_v23, %v1693_v14  ;;  %v1095_v49 = vadd.f32 %v1015_v31, %v1007_v40  ;;  %v1066_v58 = vrot.slane %v1065_v43, 1  ;;  %v1105_v17 = vstv %s1741_s5  ;;  %s1467_s5 = smov [#allocation6]  }
 0x284   :  { %v1410_v34 = vpop.eup %1409  ;;  %v1021_v37 = vmul.f32 %v1408_v28, %v1693_v14  ;;  %v1069_v7 = vadd.f32 %v1068_v36, %v1020_v26  ;;  %v1049_v10 = vadd.f32 %v1048_v55, %v1047_v38  ;;  %v1128_v20 = vunpack.c.0.s8 %v1127_v5  ;;  %s1179_s7 = sshll.u32 %s1467_s5, 4  ;;  %s1180_s7 = int_to_ptr.vmem [resolvable:$true] %s1179_s7 }
 0x285   :  { %v1412_v39 = vpop.eup %1411  ;;  %v1023_v42 = vmul.f32 %v1410_v34, %v1693_v14  ;;  %v1087_v50 = vadd.f32 %v1086_v41, %v1022_v32  ;;  %v1067_v12 = vadd.f32 %v1066_v58, %v1065_v43  ;;  %v1106_v32 = vadd.f32 %v1105_v17, %v1040_v19  ;;  %s1439_s0 = scalar_lea.vmem %s1180_s7, 128  ;;  %p1444_p6 = scmp.lt.s32.totalorder %s1180_s7, %s1180_s7 }
 0x286   :  { %v1414_v44 = vpop.eup %1413  ;;  %v1028_v46 = vmul.f32 %v1412_v39, %v1703_v29  ;;  %v1078_v53 = vadd.f32 %v1077_v45, %v1021_v37  ;;  %v1107_v25 = vadd.f32 %v1105_v17, %v1049_v10  ;;  %v1131_v36 = vsub.s32 %v1128_v20, %v1532_v11  ;;  %p1440_p5 = scmp.ne.s32.totalorder %s1180_s7, %s1439_s0  ;;  %p1445_p7 = scmp.lt.s32.totalorder %s1439_s0, %s1439_s0 }
 0x287   :  { %v1416_v48 = vpop.eup %1415  ;;  %v1030_v51 = vmul.f32 %v1414_v44, %v1703_v29  ;;  %v1096_v14 = vadd.f32 %v1095_v49, %v1023_v42  ;;  %v1109_v26 = vadd.f32 %v1105_v17, %v1067_v12 }
 0x288   :  { %v1418_v9 = vpop.eup %1417  ;;  %v1070_v54 = vadd.f32 %v1069_v7, %v1028_v46  ;;  %v1029_v0 = vmul.f32 %v1416_v48, %v1703_v29  ;;  %v1122_v39 = vcombine.low %v1106_v32, %v1107_v25  ;;  %p1446_p8 = por %p1445_p7, %p1444_p6 }
 0x289   :  { %v1088_v56 = vadd.f32 %v1087_v50, %v1030_v51  ;;  %v1031_v57 = vmul.f32 %v1418_v9, %v1703_v29  ;;  %v1058_v29 = vadd.f32 %v1057_v1, %v1056_v52 }
 0x28a   :  { %v1071_v59 = vrot.slane %v1070_v54, 4  ;;  %v1079_v60 = vadd.f32 %v1078_v53, %v1029_v0  ;;  %v1132_v46 = vrot.slane %v1122_v39, %v1131_v36  ;;  %p1447_p9 = pnand %p1446_p8, %p1440_p5 }
 0x28b   :  { %v1089_v61 = vrot.slane %v1088_v56, 4  ;;  %v1097_v62 = vadd.f32 %v1096_v14, %v1031_v57  ;;  %v1108_v33 = vadd.f32 %v1105_v17, %v1058_v29 }
 0x28c   :  { %v1072_v2 = vadd.f32 %v1071_v59, %v1070_v54  ;;  %v1080_v3 = vrot.slane %v1079_v60, 4 }
 0x28d   :  { %v1090_v6 = vadd.f32 %v1089_v61, %v1088_v56  ;;  %v1098_v8 = vrot.slane %v1097_v62, 4  ;;  %v1123_v40 = vcombine.low %v1108_v33, %v1109_v26 }
 0x28e   :  { %v1081_v13 = vadd.f32 %v1080_v3, %v1079_v60  ;;  %v1073_v15 = vrot.slane %v1072_v2, 2 }
 0x28f   :  { %v1099_v16 = vadd.f32 %v1098_v8, %v1097_v62  ;;  %v1091_v21 = vrot.slane %v1090_v6, 2  ;;  %v1139_v47 = vrot.slane %v1123_v40, %v1131_v36 }
 0x290   :  { %v1074_v18 = vadd.f32 %v1073_v15, %v1072_v2  ;;  %v1082_v22 = vrot.slane %v1081_v13, 2 }
 0x291   :  { %v1092_v23 = vadd.f32 %v1091_v21, %v1090_v6  ;;  %v1100_v24 = vrot.slane %v1099_v16, 2  ;;  %v1154_v52 = vcombine.low %v1132_v46, %v1139_v47 }
 0x292   :  { %v1075_v27 = vrot.slane %v1074_v18, 1  ;;  %v1083_v28 = vadd.f32 %v1082_v22, %v1081_v13 }
 0x293   :  { %v1093_v30 = vrot.slane %v1092_v23, 1  ;;  %v1101_v31 = vadd.f32 %v1100_v24, %v1099_v16  ;;  %v1162_v11 = vrot.slane %v1154_v52, %v1131_v36 }
 0x294   :  { %v1076_v34 = vadd.f32 %v1075_v27, %v1074_v18  ;;  %v1084_v35 = vrot.slane %v1083_v28, 1 }
 0x295   :  { %v1094_v37 = vadd.f32 %v1093_v30, %v1092_v23  ;;  %v1102_v38 = vrot.slane %v1101_v31, 1 }
 0x296   :  { %v1085_v41 = vadd.f32 %v1084_v35, %v1083_v28  ;;  %v1110_v43 = vadd.f32 %v1105_v17, %v1076_v34 }
 0x297   :  { %v1103_v42 = vadd.f32 %v1102_v38, %v1101_v31  ;;  %v1112_v45 = vadd.f32 %v1105_v17, %v1094_v37 }
 0x298   :  { %v1111_v44 = vadd.f32 %v1105_v17, %v1085_v41 }
 0x299   :  { %v1113_v7 = vadd.f32 %v1105_v17, %v1103_v42 }
 0x29a   :  { %v1124_v48 = vcombine.low %v1110_v43, %v1111_v44 }
 0x29b   :  { %v1125_v49 = vcombine.low %v1112_v45, %v1113_v7 }
 0x29c   :  { %v1146_v50 = vrot.slane %v1124_v48, %v1131_v36 }
 0x29d   :  { %v1153_v51 = vrot.slane %v1125_v49, %v1131_v36 }
 0x29f   :  { %v1155_v9 = vcombine.low %v1146_v50, %v1153_v51 }
 0x2a1   :  { %v1169_v53 = vrot.slane %v1155_v9, %v1131_v36 }
 0x2a3   :  { %v1170_v54 = vcombine.low %v1162_v11, %v1169_v53 }
 0x2a5   :  { %1172 = vst [vmem:[#allocation6] sm:$0xff] %v1170_v54 }
 0x2a6   :  { %1450 = shalt.err (!%p1447_p9)
}
 0x2a7   :  { %1182 = dma.vmem_to_hbm [thread:$0]  %s1180_s7, 128, %s1742_s6, [#allocation5]  }
 0x2a8   :  { %1461 = dma.done.wait [#allocation5], 128  }
 0x2a9   :  { %1462 = vsyncadd [#allocation5], 4294967168 }
 0x2aa   :  { %1186 = vsyncpa [#allocation4], 1 }
 0x2ab   :  { %1187 = vsyncpa [#allocation5], 1 }

// kernel: _net_forward_impl.1
= control target key start
LH: loop header
LB: loop body
LE: loop exit
PB: predicated region body
PF: predicated region fallthrough
CT: control target
= control target key end

     0   :  { %12 = vsyncpa [#allocation4], 0  ;;  %s1736_s0 = inlined_call_operand.hbm [shape: f32[1,1000], index: 0, kind: input, shape index: {}]   ;;  %s1737_s1 = inlined_call_operand.vmem [shape: f32[32,1], index: 1, kind: input, shape index: {}]   ;;  %s1738_s2 = inlined_call_operand.vmem [shape: f32[32,32], index: 2, kind: input, shape index: {}]   ;;  %s1739_s3 = inlined_call_operand.vmem [shape: f32[32,32], index: 3, kind: input, shape index: {}]   ;;  %s1740_s4 = inlined_call_operand.vmem [shape: f32[32,1], index: 4, kind: input, shape index: {}]   ;;  %s1741_s5 = inlined_call_operand.<no memory space> [shape: f32[1], index: 5, kind: input, shape index: {}]   ;;  %s1742_s6 = inlined_call_operand.hbm [shape: f32[1,1000], index: 6, kind: output, shape index: {}]  }
   0x1   :  { %13 = vsyncpa [#allocation5], 0  ;;  %s1463_s21 = smov [#allocation3]  }
   0x2   :  { %s20_s22 = sshll.u32 %s1463_s21, 4  ;;  %s21_s22 = int_to_ptr.vmem [resolvable:$true] %s20_s22 }
   0x3   :  { %s1427_s23 = scalar_lea.vmem %s21_s22, 128  ;;  %p1432_p1 = scmp.lt.s32.totalorder %s21_s22, %s21_s22 }
   0x4   :  { %p1428_p0 = scmp.ne.s32.totalorder %s21_s22, %s1427_s23  ;;  %p1433_p2 = scmp.lt.s32.totalorder %s1427_s23, %s1427_s23 }
   0x6   :  { %p1434_p3 = por %p1433_p2, %p1432_p1 }
   0x8   :  { %p1435_p4 = pnand %p1434_p3, %p1428_p0 }
   0xa   :  { %1438 = shalt.err (!%p1435_p4)
}
   0xb   :  { %23 = dma.hbm_to_vmem [thread:$0]  %s1736_s0, 128, %s21_s22, [#allocation4]  }
   0xc   :  { %1459 = dma.done.wait [#allocation4], 128  }
   0xd   :  { %1460 = vsyncadd [#allocation4], 4294967168  ;;  %v1464_v0 = vmov 0   ;;  %v40_v1 = vld [vmem:[%s1737_s1 + $0x18] sm:$0xff]  ;;  %v38_v2 = vld [vmem:[%s1737_s1 + $0x8] sm:$0xff]  ;;  %v1465_v9 = vmov 0.0   ;;  %v63_v10 = vlaneseq }
   0xe   :  { %1226 = vset.pattern.permute.xlu1 %v1464_v0  ;;  %1225 = vset.pattern.permute.xlu0 %v1464_v0  ;;  %v39_v3 = vld [vmem:[%s1737_s1 + $0x10] sm:$0xff]  ;;  %v37_v4 = vld [vmem:[%s1737_s1] sm:$0xff]  ;;  %v977_v6 = vld [vmem:[%s1740_s4 + $0x8] sm:$0xff]  ;;  %vm171_vm0 = vcmask 261120  }
   0xf   :  { %59 = vperm.xlu0 %1225, %v40_v1   ;;  %49 = vperm.xlu1 %1226, %v38_v2   ;;  %v976_v5 = vld [vmem:[%s1740_s4] sm:$0xff]  ;;  %v978_v7 = vld [vmem:[%s1740_s4 + $0x10] sm:$0xff]  ;;  %v979_v8 = vld [vmem:[%s1740_s4 + $0x18] sm:$0xff]  ;;  %v1532_v11 = vshrl.u32 %v63_v10, 7 }
  0x10   :  { %248 = vmatprep.mubr.f32.mxu0 %v1465_v9  ;;  %337 = vmatprep.mubr.f32.mxu1 %v1465_v9  ;;  %v41_v13 = vld [vmem:[#allocation3] sm:$0xff] }
  0x11   :  { %v81_v12 = vsub.s32 4, %v1532_v11  ;;  %v85_v14 = vsub.s32 5, %v1532_v11  ;;  %v89_v15 = vsub.s32 6, %v1532_v11  ;;  %v93_v16 = vsub.s32 7, %v1532_v11 }
  0x12   :  { %v65_v21 = vsub.s32 0, %v1532_v11  ;;  %v73_v23 = vsub.s32 2, %v1532_v11  ;;  %v69_v24 = vsub.s32 1, %v1532_v11  ;;  %v77_v34 = vsub.s32 3, %v1532_v11 }
  0x13   :  { %54 = vperm.xlu0 %1225, %v39_v3   ;;  %44 = vperm.xlu1 %1226, %v37_v4   ;;  %v1538_v17 = vrot.slane %v41_v13, %v81_v12  ;;  %v1540_v18 = vrot.slane %v41_v13, %v85_v14  ;;  %v1542_v20 = vrot.slane %v41_v13, %v89_v15 }
  0x14   :  { %v1545_v22 = vrot.slane %v41_v13, %v93_v16  ;;  %v66_v28 = vrot.slane %v41_v13, %v65_v21  ;;  %v74_v30 = vrot.slane %v41_v13, %v73_v23  ;;  %v70_v33 = vrot.slane %v41_v13, %v69_v24 }
  0x15   :  { %v78_v39 = vrot.slane %v41_v13, %v77_v34 }
  0x17   :  { %982 = vperm.xlu0 %1225, %v976_v5   ;;  %987 = vperm.xlu1 %1226, %v977_v6  }
  0x1b   :  { %992 = vperm.xlu0 %1225, %v978_v7   ;;  %997 = vperm.xlu1 %1226, %v979_v8  }
  0x8a   :  { %v60_v19 = vpop.permute.xlu0 %59  ;;  %v1553_v31 = vpop.permute.xlu1 %49 }
  0x8b   :  { %v131_v25 = vmul.f32 %v1538_v17, %v60_v19  ;;  %v132_v26 = vmul.f32 %v1540_v18, %v60_v19  ;;  %v133_v27 = vmul.f32 %v1542_v20, %v60_v19  ;;  %v134_v29 = vmul.f32 %v1545_v22, %v60_v19 }
  0x8c   :  { %v111_v35 = vmul.f32 %v66_v28, %v1553_v31  ;;  %v113_v36 = vmul.f32 %v74_v30, %v1553_v31  ;;  %v128_v38 = vmul.f32 %v70_v33, %v60_v19  ;;  %v130_v44 = vmul.f32 %v78_v39, %v60_v19 }
  0x8d   :  { %1227 = vtanh.f32 %v131_v25  ;;  %v127_v45 = vmul.f32 %v66_v28, %v60_v19  ;;  %v129_v46 = vmul.f32 %v74_v30, %v60_v19  ;;  %v112_v48 = vmul.f32 %v70_v33, %v1553_v31 }
  0x8e   :  { %v55_v32 = vpop.permute.xlu0 %54  ;;  %1229 = vtanh.f32 %v132_v26  ;;  %v45_v43 = vpop.permute.xlu1 %44  ;;  %v114_v49 = vmul.f32 %v78_v39, %v1553_v31  ;;  %v115_v57 = vmul.f32 %v1538_v17, %v1553_v31  ;;  %v116_v59 = vmul.f32 %v1540_v18, %v1553_v31 }
  0x8f   :  { %1231 = vtanh.f32 %v133_v27  ;;  %v119_v37 = vmul.f32 %v66_v28, %v55_v32  ;;  %v121_v40 = vmul.f32 %v74_v30, %v55_v32  ;;  %v120_v41 = vmul.f32 %v70_v33, %v55_v32 }
  0x90   :  { %1233 = vtanh.f32 %v134_v29  ;;  %v122_v42 = vmul.f32 %v78_v39, %v55_v32  ;;  %v103_v47 = vmul.f32 %v66_v28, %v45_v43  ;;  %v104_v51 = vmul.f32 %v70_v33, %v45_v43  ;;  %v168_v28 = vld [vmem:[%s1738_s2 + $0x8] sm:$0xff] }
  0x91   :  { %1235 = vtanh.f32 %v111_v35  ;;  %v106_v53 = vmul.f32 %v78_v39, %v45_v43  ;;  %v105_v55 = vmul.f32 %v74_v30, %v45_v43  ;;  %v124_v61 = vmul.f32 %v1540_v18, %v55_v32  ;;  %v169_v35 = vld [vmem:[%s1738_s2 + $0x10] sm:$0xff] }
  0x92   :  { %1237 = vtanh.f32 %v113_v36  ;;  %v126_v63 = vmul.f32 %v1545_v22, %v55_v32  ;;  %v123_v1 = vmul.f32 %v1538_v17, %v55_v32  ;;  %v125_v3 = vmul.f32 %v1542_v20, %v55_v32 }
  0x93   :  { %1239 = vtanh.f32 %v119_v37  ;;  %v117_v5 = vmul.f32 %v1542_v20, %v1553_v31  ;;  %v118_v7 = vmul.f32 %v1545_v22, %v1553_v31  ;;  %v108_v10 = vmul.f32 %v1540_v18, %v45_v43 }
  0x94   :  { %1241 = vtanh.f32 %v128_v38  ;;  %v110_v13 = vmul.f32 %v1545_v22, %v45_v43  ;;  %v107_v15 = vmul.f32 %v1538_v17, %v45_v43  ;;  %v109_v19 = vmul.f32 %v1542_v20, %v45_v43  ;;  %v167_v17 = vld [vmem:[%s1738_s2] sm:$0xff]  ;;  %v170_v38 = vld [vmem:[%s1738_s2 + $0x18] sm:$0xff] }
  0x95   :  { %1243 = vtanh.f32 %v121_v40 }
  0x96   :  { %1245 = vtanh.f32 %v120_v41 }
  0x97   :  { %1247 = vtanh.f32 %v122_v42 }
  0x98   :  { %1249 = vtanh.f32 %v130_v44 }
  0x99   :  { %1251 = vtanh.f32 %v127_v45 }
  0x9a   :  { %v1560_v50 = vpop.eup %1227  ;;  %1253 = vtanh.f32 %v129_v46 }
  0x9b   :  { %v1562_v52 = vpop.eup %1229  ;;  %1255 = vtanh.f32 %v103_v47 }
  0x9c   :  { %v1564_v54 = vpop.eup %1231  ;;  %1257 = vtanh.f32 %v112_v48 }
  0x9d   :  { %v1566_v56 = vpop.eup %1233  ;;  %1259 = vtanh.f32 %v114_v49 }
  0x9e   :  { %v1236_v58 = vpop.eup %1235  ;;  %1261 = vtanh.f32 %v104_v51 }
  0x9f   :  { %v1238_v60 = vpop.eup %1237  ;;  %1263 = vtanh.f32 %v106_v53 }
  0xa0   :  { %v1240_v62 = vpop.eup %1239  ;;  %1265 = vtanh.f32 %v105_v55 }
  0xa1   :  { %v1242_v0 = vpop.eup %1241  ;;  %1267 = vtanh.f32 %v115_v57 }
  0xa2   :  { %v1244_v2 = vpop.eup %1243  ;;  %1269 = vtanh.f32 %v116_v59  ;;  %208 = vmatprep.subr.mxu0 %v1242_v0 }
  0xa3   :  { %v1246_v4 = vpop.eup %1245  ;;  %1271 = vtanh.f32 %v124_v61 }
  0xa4   :  { %v1248_v6 = vpop.eup %1247  ;;  %1273 = vtanh.f32 %v126_v63 }
  0xa5   :  { %v1250_v8 = vpop.eup %1249  ;;  %1275 = vtanh.f32 %v123_v1 }
  0xa6   :  { %v1252_v12 = vpop.eup %1251  ;;  %1277 = vtanh.f32 %v125_v3  ;;  %297 = vmatprep.subr.mxu1 %v1250_v8 }
  0xa7   :  { %v1254_v14 = vpop.eup %1253  ;;  %1279 = vtanh.f32 %v117_v5  ;;  %209 = vmatpush1.msra.mxu0 %v1252_v12 }
  0xa8   :  { %v1256_v16 = vpop.eup %1255  ;;  %1281 = vtanh.f32 %v118_v7  ;;  %298 = vmatpush1.msra.mxu1 %v1254_v14  ;;  %210 = vmatprep.subr.mxu0 %v1246_v4 }
  0xa9   :  { %v1258_v21 = vpop.eup %1257  ;;  %1283 = vtanh.f32 %v108_v10  ;;  %299 = vmatprep.subr.mxu1 %v1248_v6  ;;  %211 = vmatpush1.msra.mxu0 %v1240_v62 }
  0xaa   :  { %v1260_v18 = vpop.eup %1259  ;;  %1285 = vtanh.f32 %v110_v13  ;;  %300 = vmatpush1.msra.mxu1 %v1244_v2  ;;  %212 = vmatprep.subr.mxu0 %v1258_v21 }
  0xab   :  { %v1262_v22 = vpop.eup %1261  ;;  %1287 = vtanh.f32 %v107_v15  ;;  %301 = vmatprep.subr.mxu1 %v1260_v18  ;;  %213 = vmatpush1.msra.mxu0 %v1236_v58 }
  0xac   :  { %v1264_v20 = vpop.eup %1263  ;;  %1289 = vtanh.f32 %v109_v19  ;;  %302 = vmatpush1.msra.mxu1 %v1238_v60  ;;  %214 = vmatprep.subr.mxu0 %v1262_v22 }
  0xad   :  { %v1266_v23 = vpop.eup %1265  ;;  %303 = vmatprep.subr.mxu1 %v1264_v20  ;;  %215 = vmatpush1.msra.mxu0 %v1256_v16 }
  0xae   :  { %v1268_v24 = vpop.eup %1267  ;;  %304 = vmatpush1.msra.mxu1 %v1266_v23  ;;  %1188 = vmatmul.mubr.msk.f32.vlgmr.msra.gmra.mxu0 %vm171_vm0, %v167_v17  ;;  %v1641_v23 = vld [vmem:[%s1739_s3] sm:$0xff] }
  0xaf   :  { %v1270_v25 = vpop.eup %1269  ;;  %1192 = vmatmul.mubr.msk.f32.vlgmr.msra.gmra.mxu1 %vm171_vm0, %v167_v17  ;;  %386 = vmatprep.subr.mxu0 %v1562_v52 }
  0xb0   :  { %v1272_v26 = vpop.eup %1271  ;;  %475 = vmatprep.subr.mxu1 %v1566_v56  ;;  %387 = vmatpush1.msra.mxu0 %v1560_v50 }
  0xb1   :  { %v1274_v27 = vpop.eup %1273  ;;  %476 = vmatpush1.msra.mxu1 %v1564_v54  ;;  %388 = vmatprep.subr.mxu0 %v1272_v26  ;;  %v573_v26 = vld [vmem:[%s1739_s3 + $0x8] sm:$0xff] }
  0xb2   :  { %v1276_v29 = vpop.eup %1275  ;;  %477 = vmatprep.subr.mxu1 %v1274_v27  ;;  %254 = vmatprep.mubr.f32.mxu0 %v1465_v9 }
  0xb3   :  { %v1278_v30 = vpop.eup %1277  ;;  %343 = vmatprep.mubr.f32.mxu1 %v1465_v9  ;;  %389 = vmatpush1.msra.mxu0 %v1276_v29 }
  0xb4   :  { %v1280_v31 = vpop.eup %1279  ;;  %478 = vmatpush1.msra.mxu1 %v1278_v30  ;;  %1189 = vmatmul.mubr.msk.f32.gmra.mxu0 %vm171_vm0, %v168_v28  ;;  %v574_v30 = vld [vmem:[%s1739_s3 + $0x10] sm:$0xff] }
  0xb5   :  { %v1282_v32 = vpop.eup %1281  ;;  %1193 = vmatmul.mubr.msk.f32.gmra.mxu1 %vm171_vm0, %v168_v28  ;;  %390 = vmatprep.subr.mxu0 %v1270_v25 }
  0xb6   :  { %v1284_v33 = vpop.eup %1283  ;;  %479 = vmatprep.subr.mxu1 %v1282_v32  ;;  %391 = vmatpush1.msra.mxu0 %v1268_v24 }
  0xb7   :  { %v1286_v34 = vpop.eup %1285  ;;  %480 = vmatpush1.msra.mxu1 %v1280_v31  ;;  %392 = vmatprep.subr.mxu0 %v1284_v33 }
  0xb8   :  { %v1288_v36 = vpop.eup %1287  ;;  %481 = vmatprep.subr.mxu1 %v1286_v34  ;;  %260 = vmatprep.mubr.f32.mxu0 %v1465_v9 }
  0xb9   :  { %v1290_v37 = vpop.eup %1289  ;;  %349 = vmatprep.mubr.f32.mxu1 %v1465_v9  ;;  %393 = vmatpush1.msra.mxu0 %v1288_v36 }
  0xba   :  { %482 = vmatpush1.msra.mxu1 %v1290_v37  ;;  %1190 = vmatmul.mubr.msk.f32.gmra.mxu0 %vm171_vm0, %v169_v35  ;;  %v575_v37 = vld [vmem:[%s1739_s3 + $0x18] sm:$0xff] }
  0xbb   :  { %1194 = vmatmul.mubr.msk.f32.gmra.mxu1 %vm171_vm0, %v169_v35  ;;  %266 = vmatprep.mubr.f32.mxu0 %v1465_v9 }
  0xbc   :  { %355 = vmatprep.mubr.f32.mxu1 %v1465_v9 }
  0xbe   :  { %1191 = vmatmul.mubr.msk.f32.gmra.mxu0 %vm171_vm0, %v170_v38 }
  0xbf   :  { %1195 = vmatmul.mubr.msk.f32.gmra.mxu1 %vm171_vm0, %v170_v38  ;;  %426 = vmatprep.mubr.f32.mxu0 %v1465_v9 }
  0xc0   :  { %515 = vmatprep.mubr.f32.mxu1 %v1465_v9 }
  0xc2   :  { %1196 = vmatmul.mubr.msk.f32.vlgmr.msra.gmra.mxu0 %vm171_vm0, %v167_v17 }
  0xc3   :  { %1200 = vmatmul.mubr.msk.f32.vlgmr.msra.gmra.mxu1 %vm171_vm0, %v167_v17  ;;  %432 = vmatprep.mubr.f32.mxu0 %v1465_v9 }
  0xc4   :  { %521 = vmatprep.mubr.f32.mxu1 %v1465_v9 }
  0xc6   :  { %1197 = vmatmul.mubr.msk.f32.gmra.mxu0 %vm171_vm0, %v168_v28 }
  0xc7   :  { %1201 = vmatmul.mubr.msk.f32.gmra.mxu1 %vm171_vm0, %v168_v28  ;;  %438 = vmatprep.mubr.f32.mxu0 %v1465_v9 }
  0xc8   :  { %527 = vmatprep.mubr.f32.mxu1 %v1465_v9 }
  0xca   :  { %1198 = vmatmul.mubr.msk.f32.gmra.mxu0 %vm171_vm0, %v169_v35 }
  0xcb   :  { %1202 = vmatmul.mubr.msk.f32.gmra.mxu1 %vm171_vm0, %v169_v35  ;;  %444 = vmatprep.mubr.f32.mxu0 %v1465_v9 }
  0xcc   :  { %533 = vmatprep.mubr.f32.mxu1 %v1465_v9 }
  0xce   :  { %1199 = vmatmul.mubr.msk.f32.gmra.mxu0 %vm171_vm0, %v170_v38 }
  0xcf   :  { %1203 = vmatmul.mubr.msk.f32.gmra.mxu1 %vm171_vm0, %v170_v38  ;;  %652 = vmatprep.mubr.f32.mxu0 %v1465_v9 }
  0xd0   :  { %741 = vmatprep.mubr.f32.mxu1 %v1465_v9 }
 0x16e   :  { %v250_v39 = vpop.f32.mrf.mxu0 }
 0x16f   :  { %v339_v40 = vpop.f32.mrf.mxu1  ;;  %1291 = vtanh.f32 %v250_v39 }
 0x170   :  { %v252_v41 = vpop.f32.mrf.mxu0 }
 0x171   :  { %v341_v42 = vpop.f32.mrf.mxu1  ;;  %1293 = vtanh.f32 %v252_v41 }
 0x174   :  { %v256_v43 = vpop.f32.mrf.mxu0 }
 0x175   :  { %v345_v44 = vpop.f32.mrf.mxu1  ;;  %1295 = vtanh.f32 %v256_v43 }
 0x176   :  { %v258_v45 = vpop.f32.mrf.mxu0 }
 0x177   :  { %v347_v46 = vpop.f32.mrf.mxu1  ;;  %1297 = vtanh.f32 %v258_v45 }
 0x17a   :  { %v262_v47 = vpop.f32.mrf.mxu0 }
 0x17b   :  { %v351_v48 = vpop.f32.mrf.mxu1  ;;  %1299 = vtanh.f32 %v262_v47 }
 0x17c   :  { %v264_v49 = vpop.f32.mrf.mxu0  ;;  %v1292_v60 = vpop.eup %1291 }
 0x17d   :  { %v353_v50 = vpop.f32.mrf.mxu1  ;;  %1301 = vtanh.f32 %v264_v49 }
 0x17e   :  { %v268_v51 = vpop.f32.mrf.mxu0  ;;  %v1294_v62 = vpop.eup %1293 }
 0x17f   :  { %v357_v52 = vpop.f32.mrf.mxu1  ;;  %1303 = vtanh.f32 %v268_v51 }
 0x180   :  { %v270_v53 = vpop.f32.mrf.mxu0 }
 0x181   :  { %1305 = vtanh.f32 %v270_v53  ;;  %v359_v54 = vpop.f32.mrf.mxu1 }
 0x182   :  { %1307 = vtanh.f32 %v359_v54  ;;  %v1632_v55 = vpop.f32.mrf.mxu0  ;;  %v1296_v0 = vpop.eup %1295 }
 0x183   :  { %1309 = vtanh.f32 %v357_v52  ;;  %v1634_v56 = vpop.f32.mrf.mxu1 }
 0x184   :  { %1311 = vtanh.f32 %v353_v50  ;;  %v430_v57 = vpop.f32.mrf.mxu0  ;;  %v1298_v2 = vpop.eup %1297 }
 0x185   :  { %1313 = vtanh.f32 %v351_v48  ;;  %v1636_v58 = vpop.f32.mrf.mxu1 }
 0x186   :  { %1315 = vtanh.f32 %v347_v46  ;;  %v434_v59 = vpop.f32.mrf.mxu0 }
 0x187   :  { %1317 = vtanh.f32 %v345_v44  ;;  %v523_v61 = vpop.f32.mrf.mxu1 }
 0x188   :  { %1319 = vtanh.f32 %v341_v42  ;;  %v436_v63 = vpop.f32.mrf.mxu0  ;;  %v1300_v4 = vpop.eup %1299 }
 0x189   :  { %1321 = vtanh.f32 %v339_v40  ;;  %v525_v1 = vpop.f32.mrf.mxu1 }
 0x18a   :  { %v440_v3 = vpop.f32.mrf.mxu0  ;;  %v1302_v6 = vpop.eup %1301  ;;  %1323 = vtanh.f32 %v430_v57 }
 0x18b   :  { %v529_v5 = vpop.f32.mrf.mxu1  ;;  %1325 = vtanh.f32 %v434_v59 }
 0x18c   :  { %v442_v7 = vpop.f32.mrf.mxu0  ;;  %v1304_v8 = vpop.eup %1303 }
 0x18d   :  { %v531_v10 = vpop.f32.mrf.mxu1  ;;  %1327 = vtanh.f32 %v442_v7  ;;  %v1691_v7 = vpop.permute.xlu1 %987 }
 0x18e   :  { %v1306_v12 = vpop.eup %1305  ;;  %v446_v13 = vpop.f32.mrf.mxu0 }
 0x18f   :  { %v1308_v14 = vpop.eup %1307  ;;  %v535_v15 = vpop.f32.mrf.mxu1  ;;  %612 = vmatprep.subr.mxu0 %v1306_v12  ;;  %1329 = vtanh.f32 %v446_v13 }
 0x190   :  { %v1310_v16 = vpop.eup %1309  ;;  %701 = vmatprep.subr.mxu1 %v1308_v14  ;;  %v448_v19 = vpop.f32.mrf.mxu0  ;;  %613 = vmatpush1.msra.mxu0 %v1304_v8 }
 0x191   :  { %v1312_v21 = vpop.eup %1311  ;;  %1331 = vtanh.f32 %v448_v19  ;;  %v537_v18 = vpop.f32.mrf.mxu1  ;;  %702 = vmatpush1.msra.mxu1 %v1310_v16  ;;  %614 = vmatprep.subr.mxu0 %v1302_v6 }
 0x192   :  { %v1314_v22 = vpop.eup %1313  ;;  %1333 = vtanh.f32 %v537_v18  ;;  %703 = vmatprep.subr.mxu1 %v1312_v21  ;;  %615 = vmatpush1.msra.mxu0 %v1300_v4 }
 0x193   :  { %v1316_v17 = vpop.eup %1315  ;;  %1335 = vtanh.f32 %v535_v15  ;;  %704 = vmatpush1.msra.mxu1 %v1314_v22  ;;  %616 = vmatprep.subr.mxu0 %v1298_v2 }
 0x194   :  { %v1318_v20 = vpop.eup %1317  ;;  %1337 = vtanh.f32 %v531_v10  ;;  %705 = vmatprep.subr.mxu1 %v1316_v17  ;;  %617 = vmatpush1.msra.mxu0 %v1296_v0  ;;  %v1689_v0 = vpop.permute.xlu0 %982 }
 0x195   :  { %v1320_v24 = vpop.eup %1319  ;;  %1339 = vtanh.f32 %v440_v3  ;;  %706 = vmatpush1.msra.mxu1 %v1318_v20  ;;  %618 = vmatprep.subr.mxu0 %v1294_v62 }
 0x196   :  { %v1322_v25 = vpop.eup %1321  ;;  %1341 = vtanh.f32 %v529_v5  ;;  %707 = vmatprep.subr.mxu1 %v1320_v24  ;;  %619 = vmatpush1.msra.mxu0 %v1292_v60 }
 0x197   :  { %1343 = vtanh.f32 %v436_v63  ;;  %708 = vmatpush1.msra.mxu1 %v1322_v25  ;;  %1204 = vmatmul.mubr.msk.f32.vlgmr.msra.gmra.mxu0 %vm171_vm0, %v1641_v23  ;;  %v1324_v27 = vpop.eup %1323 }
 0x198   :  { %1345 = vtanh.f32 %v525_v1  ;;  %1208 = vmatmul.mubr.msk.f32.vlgmr.msra.gmra.mxu1 %vm171_vm0, %v1641_v23  ;;  %658 = vmatprep.mubr.f32.mxu0 %v1465_v9  ;;  %v1326_v28 = vpop.eup %1325  ;;  %v1693_v14 = vpop.permute.xlu0 %992 }
 0x199   :  { %1347 = vtanh.f32 %v523_v61  ;;  %747 = vmatprep.mubr.f32.mxu1 %v1465_v9 }
 0x19a   :  { %1349 = vtanh.f32 %v1636_v58  ;;  %v1328_v29 = vpop.eup %1327 }
 0x19b   :  { %1351 = vtanh.f32 %v1632_v55  ;;  %1205 = vmatmul.mubr.msk.f32.gmra.mxu0 %vm171_vm0, %v573_v26 }
 0x19c   :  { %1353 = vtanh.f32 %v1634_v56  ;;  %1209 = vmatmul.mubr.msk.f32.gmra.mxu1 %vm171_vm0, %v573_v26  ;;  %664 = vmatprep.mubr.f32.mxu0 %v1465_v9  ;;  %v1330_v31 = vpop.eup %1329 }
 0x19d   :  { %753 = vmatprep.mubr.f32.mxu1 %v1465_v9 }
 0x19e   :  { %v1332_v32 = vpop.eup %1331 }
 0x19f   :  { %v1334_v33 = vpop.eup %1333  ;;  %1206 = vmatmul.mubr.msk.f32.gmra.mxu0 %vm171_vm0, %v574_v30  ;;  %790 = vmatprep.subr.mxu0 %v1332_v32 }
 0x1a0   :  { %v1336_v34 = vpop.eup %1335  ;;  %1210 = vmatmul.mubr.msk.f32.gmra.mxu1 %vm171_vm0, %v574_v30  ;;  %879 = vmatprep.subr.mxu1 %v1334_v33 }
 0x1a1   :  { %v1338_v35 = vpop.eup %1337  ;;  %791 = vmatpush1.msra.mxu0 %v1330_v31  ;;  %880 = vmatpush1.msra.mxu1 %v1336_v34 }
 0x1a2   :  { %v1340_v36 = vpop.eup %1339  ;;  %792 = vmatprep.subr.mxu0 %v1328_v29  ;;  %881 = vmatprep.subr.mxu1 %v1338_v35  ;;  %v1703_v29 = vpop.permute.xlu1 %997 }
 0x1a3   :  { %v1342_v38 = vpop.eup %1341  ;;  %670 = vmatprep.mubr.f32.mxu0 %v1465_v9  ;;  %759 = vmatprep.mubr.f32.mxu1 %v1465_v9 }
 0x1a4   :  { %v1344_v39 = vpop.eup %1343  ;;  %793 = vmatpush1.msra.mxu0 %v1340_v36  ;;  %882 = vmatpush1.msra.mxu1 %v1342_v38 }
 0x1a5   :  { %v1346_v40 = vpop.eup %1345  ;;  %1207 = vmatmul.mubr.msk.f32.gmra.mxu0 %vm171_vm0, %v575_v37  ;;  %1211 = vmatmul.mubr.msk.f32.gmra.mxu1 %vm171_vm0, %v575_v37 }
 0x1a6   :  { %v1348_v41 = vpop.eup %1347  ;;  %794 = vmatprep.subr.mxu0 %v1344_v39  ;;  %883 = vmatprep.subr.mxu1 %v1346_v40 }
 0x1a7   :  { %v1350_v42 = vpop.eup %1349  ;;  %795 = vmatpush1.msra.mxu0 %v1326_v28  ;;  %884 = vmatpush1.msra.mxu1 %v1348_v41 }
 0x1a8   :  { %v1352_v43 = vpop.eup %1351  ;;  %796 = vmatprep.subr.mxu0 %v1324_v27  ;;  %885 = vmatprep.subr.mxu1 %v1350_v42 }
 0x1a9   :  { %v1354_v44 = vpop.eup %1353  ;;  %797 = vmatpush1.msra.mxu0 %v1352_v43  ;;  %830 = vmatprep.mubr.f32.mxu0 %v1465_v9 }
 0x1aa   :  { %886 = vmatpush1.msra.mxu1 %v1354_v44  ;;  %919 = vmatprep.mubr.f32.mxu1 %v1465_v9 }
 0x1ab   :  { %1212 = vmatmul.mubr.msk.f32.vlgmr.msra.gmra.mxu0 %vm171_vm0, %v1641_v23  ;;  %1216 = vmatmul.mubr.msk.f32.vlgmr.msra.gmra.mxu1 %vm171_vm0, %v1641_v23 }
 0x1ac   :  { %836 = vmatprep.mubr.f32.mxu0 %v1465_v9  ;;  %925 = vmatprep.mubr.f32.mxu1 %v1465_v9 }
 0x1af   :  { %1213 = vmatmul.mubr.msk.f32.gmra.mxu0 %vm171_vm0, %v573_v26  ;;  %1217 = vmatmul.mubr.msk.f32.gmra.mxu1 %vm171_vm0, %v573_v26 }
 0x1b0   :  { %842 = vmatprep.mubr.f32.mxu0 %v1465_v9  ;;  %931 = vmatprep.mubr.f32.mxu1 %v1465_v9 }
 0x1b3   :  { %1214 = vmatmul.mubr.msk.f32.gmra.mxu0 %vm171_vm0, %v574_v30  ;;  %1218 = vmatmul.mubr.msk.f32.gmra.mxu1 %vm171_vm0, %v574_v30 }
 0x1b4   :  { %848 = vmatprep.mubr.f32.mxu0 %v1465_v9  ;;  %937 = vmatprep.mubr.f32.mxu1 %v1465_v9 }
 0x1b7   :  { %1215 = vmatmul.mubr.msk.f32.gmra.mxu0 %vm171_vm0, %v575_v37  ;;  %1219 = vmatmul.mubr.msk.f32.gmra.mxu1 %vm171_vm0, %v575_v37 }
 0x257   :  { %v654_v45 = vpop.f32.mrf.mxu0 }
 0x258   :  { %1355 = vtanh.f32 %v654_v45  ;;  %v743_v46 = vpop.f32.mrf.mxu1 }
 0x259   :  { %1357 = vtanh.f32 %v743_v46  ;;  %v656_v47 = vpop.f32.mrf.mxu0 }
 0x25a   :  { %1359 = vtanh.f32 %v656_v47  ;;  %v745_v48 = vpop.f32.mrf.mxu1 }
 0x25b   :  { %1361 = vtanh.f32 %v745_v48  ;;  %v660_v49 = vpop.f32.mrf.mxu0 }
 0x25c   :  { %1363 = vtanh.f32 %v660_v49  ;;  %v749_v50 = vpop.f32.mrf.mxu1 }
 0x25d   :  { %1365 = vtanh.f32 %v749_v50  ;;  %v662_v51 = vpop.f32.mrf.mxu0 }
 0x25e   :  { %1367 = vtanh.f32 %v662_v51  ;;  %v751_v52 = vpop.f32.mrf.mxu1 }
 0x25f   :  { %1369 = vtanh.f32 %v751_v52  ;;  %v666_v9 = vpop.f32.mrf.mxu0 }
 0x260   :  { %1371 = vtanh.f32 %v666_v9  ;;  %v755_v53 = vpop.f32.mrf.mxu1 }
 0x261   :  { %1373 = vtanh.f32 %v755_v53  ;;  %v668_v54 = vpop.f32.mrf.mxu0 }
 0x262   :  { %1375 = vtanh.f32 %v668_v54  ;;  %v757_v55 = vpop.f32.mrf.mxu1 }
 0x263   :  { %1377 = vtanh.f32 %v757_v55 }
 0x265   :  { %v1356_v56 = vpop.eup %1355  ;;  %v672_v57 = vpop.f32.mrf.mxu0 }
 0x266   :  { %v761_v58 = vpop.f32.mrf.mxu1  ;;  %v1358_v59 = vpop.eup %1357  ;;  %1379 = vtanh.f32 %v672_v57  ;;  %v1000_v17 = vmul.f32 %v1356_v56, %v1689_v0 }
 0x267   :  { %v1360_v60 = vpop.eup %1359  ;;  %1381 = vtanh.f32 %v761_v58  ;;  %v674_v61 = vpop.f32.mrf.mxu0  ;;  %v1002_v24 = vmul.f32 %v1358_v59, %v1689_v0 }
 0x268   :  { %v763_v62 = vpop.f32.mrf.mxu1  ;;  %v1362_v63 = vpop.eup %1361  ;;  %1383 = vtanh.f32 %v674_v61  ;;  %v1001_v30 = vmul.f32 %v1360_v60, %v1689_v0 }
 0x269   :  { %v1364_v1 = vpop.eup %1363  ;;  %1385 = vtanh.f32 %v763_v62  ;;  %v1003_v34 = vmul.f32 %v1362_v63, %v1689_v0 }
 0x26a   :  { %v1366_v2 = vpop.eup %1365  ;;  %v1008_v15 = vmul.f32 %v1364_v1, %v1691_v7 }
 0x26b   :  { %v1368_v3 = vpop.eup %1367  ;;  %v832_v4 = vpop.f32.mrf.mxu0  ;;  %v1010_v19 = vmul.f32 %v1366_v2, %v1691_v7 }
 0x26c   :  { %v921_v5 = vpop.f32.mrf.mxu1  ;;  %v1370_v6 = vpop.eup %1369  ;;  %1387 = vtanh.f32 %v832_v4  ;;  %v1009_v20 = vmul.f32 %v1368_v3, %v1691_v7  ;;  %v1032_v31 = vadd.f32 %v1008_v15, %v1000_v17 }
 0x26d   :  { %v1372_v8 = vpop.eup %1371  ;;  %1389 = vtanh.f32 %v921_v5  ;;  %v834_v10 = vpop.f32.mrf.mxu0  ;;  %v1011_v25 = vmul.f32 %v1370_v6, %v1691_v7  ;;  %v1050_v35 = vadd.f32 %v1010_v19, %v1002_v24 }
 0x26e   :  { %v923_v12 = vpop.f32.mrf.mxu1  ;;  %v1374_v13 = vpop.eup %1373  ;;  %1391 = vtanh.f32 %v834_v10  ;;  %v1016_v23 = vmul.f32 %v1372_v8, %v1693_v14  ;;  %v1041_v40 = vadd.f32 %v1009_v20, %v1001_v30 }
 0x26f   :  { %v1376_v16 = vpop.eup %1375  ;;  %1393 = vtanh.f32 %v923_v12  ;;  %v838_v21 = vpop.f32.mrf.mxu0  ;;  %v1018_v26 = vmul.f32 %v1374_v13, %v1693_v14  ;;  %v1059_v44 = vadd.f32 %v1011_v25, %v1003_v34 }
 0x270   :  { %v927_v18 = vpop.f32.mrf.mxu1  ;;  %v1378_v22 = vpop.eup %1377  ;;  %1395 = vtanh.f32 %v838_v21  ;;  %v1017_v32 = vmul.f32 %v1376_v16, %v1693_v14  ;;  %v1033_v41 = vadd.f32 %v1032_v31, %v1016_v23 }
 0x271   :  { %1397 = vtanh.f32 %v927_v18  ;;  %v840_v27 = vpop.f32.mrf.mxu0  ;;  %v1019_v36 = vmul.f32 %v1378_v22, %v1693_v14  ;;  %v1051_v45 = vadd.f32 %v1050_v35, %v1018_v26 }
 0x272   :  { %v929_v28 = vpop.f32.mrf.mxu1  ;;  %1399 = vtanh.f32 %v840_v27  ;;  %v1042_v50 = vadd.f32 %v1041_v40, %v1017_v32 }
 0x273   :  { %v1380_v33 = vpop.eup %1379  ;;  %1401 = vtanh.f32 %v929_v28  ;;  %v844_v37 = vpop.f32.mrf.mxu0  ;;  %v1060_v9 = vadd.f32 %v1059_v44, %v1019_v36 }
 0x274   :  { %v933_v38 = vpop.f32.mrf.mxu1  ;;  %v1382_v39 = vpop.eup %1381  ;;  %v1024_v42 = vmul.f32 %v1380_v33, %v1703_v29  ;;  %1403 = vtanh.f32 %v844_v37 }
 0x275   :  { %v1384_v43 = vpop.eup %1383  ;;  %v1026_v46 = vmul.f32 %v1382_v39, %v1703_v29  ;;  %1405 = vtanh.f32 %v933_v38  ;;  %v846_v47 = vpop.f32.mrf.mxu0 }
 0x276   :  { %v935_v48 = vpop.f32.mrf.mxu1  ;;  %v1386_v49 = vpop.eup %1385  ;;  %v1034_v51 = vadd.f32 %v1033_v41, %v1024_v42  ;;  %v1025_v52 = vmul.f32 %v1384_v43, %v1703_v29  ;;  %1407 = vtanh.f32 %v846_v47 }
 0x277   :  { %v1052_v53 = vadd.f32 %v1051_v45, %v1026_v46  ;;  %v1027_v54 = vmul.f32 %v1386_v49, %v1703_v29  ;;  %1409 = vtanh.f32 %v935_v48  ;;  %v850_v55 = vpop.f32.mrf.mxu0 }
 0x278   :  { %v939_v56 = vpop.f32.mrf.mxu1  ;;  %v1043_v57 = vadd.f32 %v1042_v50, %v1025_v52  ;;  %1411 = vtanh.f32 %v850_v55  ;;  %v1035_v63 = vrot.slane %v1034_v51, 4 }
 0x279   :  { %v1388_v58 = vpop.eup %1387  ;;  %v1061_v59 = vadd.f32 %v1060_v9, %v1027_v54  ;;  %1413 = vtanh.f32 %v939_v56  ;;  %v852_v60 = vpop.f32.mrf.mxu0  ;;  %v1053_v3 = vrot.slane %v1052_v53, 4 }
 0x27a   :  { %v941_v61 = vpop.f32.mrf.mxu1  ;;  %v1390_v62 = vpop.eup %1389  ;;  %v1044_v1 = vrot.slane %v1043_v57, 4  ;;  %1415 = vtanh.f32 %v852_v60  ;;  %v1036_v13 = vadd.f32 %v1035_v63, %v1034_v51  ;;  %v1004_v24 = vmul.f32 %v1388_v58, %v1689_v0 }
 0x27b   :  { %v1392_v2 = vpop.eup %1391  ;;  %v1062_v4 = vrot.slane %v1061_v59, 4  ;;  %1417 = vtanh.f32 %v941_v61  ;;  %v1054_v16 = vadd.f32 %v1053_v3, %v1052_v53  ;;  %v1006_v30 = vmul.f32 %v1390_v62, %v1689_v0 }
 0x27c   :  { %v1394_v5 = vpop.eup %1393  ;;  %v1045_v6 = vadd.f32 %v1044_v1, %v1043_v57  ;;  %v1037_v27 = vrot.slane %v1036_v13, 2  ;;  %v1005_v35 = vmul.f32 %v1392_v2, %v1689_v0 }
 0x27d   :  { %v1396_v8 = vpop.eup %1395  ;;  %v1063_v10 = vadd.f32 %v1062_v4, %v1061_v59  ;;  %v1055_v33 = vrot.slane %v1054_v16, 2  ;;  %v1007_v40 = vmul.f32 %v1394_v5, %v1689_v0  ;;  %v1466_v4 = vmov 1966171168  }
 0x27e   :  { %v1398_v12 = vpop.eup %1397  ;;  %v1012_v21 = vmul.f32 %v1396_v8, %v1691_v7  ;;  %v1046_v18 = vrot.slane %v1045_v6, 2  ;;  %v1038_v47 = vadd.f32 %v1037_v27, %v1036_v13  ;;  %v1127_v5 = vunpack.c.l.s4 %v1466_v4 }
 0x27f   :  { %v1400_v15 = vpop.eup %1399  ;;  %v1014_v17 = vmul.f32 %v1398_v12, %v1691_v7  ;;  %v1064_v20 = vrot.slane %v1063_v10, 2  ;;  %v1056_v52 = vadd.f32 %v1055_v33, %v1054_v16 }
 0x280   :  { %v1402_v19 = vpop.eup %1401  ;;  %v1013_v25 = vmul.f32 %v1400_v15, %v1691_v7  ;;  %v1068_v36 = vadd.f32 %v1012_v21, %v1004_v24  ;;  %v1047_v38 = vadd.f32 %v1046_v18, %v1045_v6  ;;  %v1039_v63 = vrot.slane %v1038_v47, 1 }
 0x281   :  { %v1404_v22 = vpop.eup %1403  ;;  %v1015_v31 = vmul.f32 %v1402_v19, %v1691_v7  ;;  %v1086_v41 = vadd.f32 %v1014_v17, %v1006_v30  ;;  %v1065_v43 = vadd.f32 %v1064_v20, %v1063_v10  ;;  %v1057_v1 = vrot.slane %v1056_v52, 1 }
 0x282   :  { %v1406_v23 = vpop.eup %1405  ;;  %v1020_v26 = vmul.f32 %v1404_v22, %v1693_v14  ;;  %v1077_v45 = vadd.f32 %v1013_v25, %v1005_v35  ;;  %v1048_v55 = vrot.slane %v1047_v38, 1  ;;  %v1040_v19 = vadd.f32 %v1039_v63, %v1038_v47 }
 0x283   :  { %v1408_v28 = vpop.eup %1407  ;;  %v1022_v32 = vmul.f32 %v1406_v23, %v1693_v14  ;;  %v1095_v49 = vadd.f32 %v1015_v31, %v1007_v40  ;;  %v1066_v58 = vrot.slane %v1065_v43, 1  ;;  %v1105_v17 = vstv %s1741_s5  ;;  %s1467_s5 = smov [#allocation6]  }
 0x284   :  { %v1410_v34 = vpop.eup %1409  ;;  %v1021_v37 = vmul.f32 %v1408_v28, %v1693_v14  ;;  %v1069_v7 = vadd.f32 %v1068_v36, %v1020_v26  ;;  %v1049_v10 = vadd.f32 %v1048_v55, %v1047_v38  ;;  %v1128_v20 = vunpack.c.0.s8 %v1127_v5  ;;  %s1179_s7 = sshll.u32 %s1467_s5, 4  ;;  %s1180_s7 = int_to_ptr.vmem [resolvable:$true] %s1179_s7 }
 0x285   :  { %v1412_v39 = vpop.eup %1411  ;;  %v1023_v42 = vmul.f32 %v1410_v34, %v1693_v14  ;;  %v1087_v50 = vadd.f32 %v1086_v41, %v1022_v32  ;;  %v1067_v12 = vadd.f32 %v1066_v58, %v1065_v43  ;;  %v1106_v32 = vadd.f32 %v1105_v17, %v1040_v19  ;;  %s1439_s0 = scalar_lea.vmem %s1180_s7, 128  ;;  %p1444_p6 = scmp.lt.s32.totalorder %s1180_s7, %s1180_s7 }
 0x286   :  { %v1414_v44 = vpop.eup %1413  ;;  %v1028_v46 = vmul.f32 %v1412_v39, %v1703_v29  ;;  %v1078_v53 = vadd.f32 %v1077_v45, %v1021_v37  ;;  %v1107_v25 = vadd.f32 %v1105_v17, %v1049_v10  ;;  %v1131_v36 = vsub.s32 %v1128_v20, %v1532_v11  ;;  %p1440_p5 = scmp.ne.s32.totalorder %s1180_s7, %s1439_s0  ;;  %p1445_p7 = scmp.lt.s32.totalorder %s1439_s0, %s1439_s0 }
 0x287   :  { %v1416_v48 = vpop.eup %1415  ;;  %v1030_v51 = vmul.f32 %v1414_v44, %v1703_v29  ;;  %v1096_v14 = vadd.f32 %v1095_v49, %v1023_v42  ;;  %v1109_v26 = vadd.f32 %v1105_v17, %v1067_v12 }
 0x288   :  { %v1418_v9 = vpop.eup %1417  ;;  %v1070_v54 = vadd.f32 %v1069_v7, %v1028_v46  ;;  %v1029_v0 = vmul.f32 %v1416_v48, %v1703_v29  ;;  %v1122_v39 = vcombine.low %v1106_v32, %v1107_v25  ;;  %p1446_p8 = por %p1445_p7, %p1444_p6 }
 0x289   :  { %v1088_v56 = vadd.f32 %v1087_v50, %v1030_v51  ;;  %v1031_v57 = vmul.f32 %v1418_v9, %v1703_v29  ;;  %v1058_v29 = vadd.f32 %v1057_v1, %v1056_v52 }
 0x28a   :  { %v1071_v59 = vrot.slane %v1070_v54, 4  ;;  %v1079_v60 = vadd.f32 %v1078_v53, %v1029_v0  ;;  %v1132_v46 = vrot.slane %v1122_v39, %v1131_v36  ;;  %p1447_p9 = pnand %p1446_p8, %p1440_p5 }
 0x28b   :  { %v1089_v61 = vrot.slane %v1088_v56, 4  ;;  %v1097_v62 = vadd.f32 %v1096_v14, %v1031_v57  ;;  %v1108_v33 = vadd.f32 %v1105_v17, %v1058_v29 }
 0x28c   :  { %v1072_v2 = vadd.f32 %v1071_v59, %v1070_v54  ;;  %v1080_v3 = vrot.slane %v1079_v60, 4 }
 0x28d   :  { %v1090_v6 = vadd.f32 %v1089_v61, %v1088_v56  ;;  %v1098_v8 = vrot.slane %v1097_v62, 4  ;;  %v1123_v40 = vcombine.low %v1108_v33, %v1109_v26 }
 0x28e   :  { %v1081_v13 = vadd.f32 %v1080_v3, %v1079_v60  ;;  %v1073_v15 = vrot.slane %v1072_v2, 2 }
 0x28f   :  { %v1099_v16 = vadd.f32 %v1098_v8, %v1097_v62  ;;  %v1091_v21 = vrot.slane %v1090_v6, 2  ;;  %v1139_v47 = vrot.slane %v1123_v40, %v1131_v36 }
 0x290   :  { %v1074_v18 = vadd.f32 %v1073_v15, %v1072_v2  ;;  %v1082_v22 = vrot.slane %v1081_v13, 2 }
 0x291   :  { %v1092_v23 = vadd.f32 %v1091_v21, %v1090_v6  ;;  %v1100_v24 = vrot.slane %v1099_v16, 2  ;;  %v1154_v52 = vcombine.low %v1132_v46, %v1139_v47 }
 0x292   :  { %v1075_v27 = vrot.slane %v1074_v18, 1  ;;  %v1083_v28 = vadd.f32 %v1082_v22, %v1081_v13 }
 0x293   :  { %v1093_v30 = vrot.slane %v1092_v23, 1  ;;  %v1101_v31 = vadd.f32 %v1100_v24, %v1099_v16  ;;  %v1162_v11 = vrot.slane %v1154_v52, %v1131_v36 }
 0x294   :  { %v1076_v34 = vadd.f32 %v1075_v27, %v1074_v18  ;;  %v1084_v35 = vrot.slane %v1083_v28, 1 }
 0x295   :  { %v1094_v37 = vadd.f32 %v1093_v30, %v1092_v23  ;;  %v1102_v38 = vrot.slane %v1101_v31, 1 }
 0x296   :  { %v1085_v41 = vadd.f32 %v1084_v35, %v1083_v28  ;;  %v1110_v43 = vadd.f32 %v1105_v17, %v1076_v34 }
 0x297   :  { %v1103_v42 = vadd.f32 %v1102_v38, %v1101_v31  ;;  %v1112_v45 = vadd.f32 %v1105_v17, %v1094_v37 }
 0x298   :  { %v1111_v44 = vadd.f32 %v1105_v17, %v1085_v41 }
 0x299   :  { %v1113_v7 = vadd.f32 %v1105_v17, %v1103_v42 }
 0x29a   :  { %v1124_v48 = vcombine.low %v1110_v43, %v1111_v44 }
 0x29b   :  { %v1125_v49 = vcombine.low %v1112_v45, %v1113_v7 }
 0x29c   :  { %v1146_v50 = vrot.slane %v1124_v48, %v1131_v36 }
 0x29d   :  { %v1153_v51 = vrot.slane %v1125_v49, %v1131_v36 }
 0x29f   :  { %v1155_v9 = vcombine.low %v1146_v50, %v1153_v51 }
 0x2a1   :  { %v1169_v53 = vrot.slane %v1155_v9, %v1131_v36 }
 0x2a3   :  { %v1170_v54 = vcombine.low %v1162_v11, %v1169_v53 }
 0x2a5   :  { %1172 = vst [vmem:[#allocation6] sm:$0xff] %v1170_v54 }
 0x2a6   :  { %1450 = shalt.err (!%p1447_p9)
}
 0x2a7   :  { %1182 = dma.vmem_to_hbm [thread:$0]  %s1180_s7, 128, %s1742_s6, [#allocation5]  }
 0x2a8   :  { %1461 = dma.done.wait [#allocation5], 128  }
 0x2a9   :  { %1462 = vsyncadd [#allocation5], 4294967168 }
 0x2aa   :  { %1186 = vsyncpa [#allocation4], 1 }
 0x2ab   :  { %1187 = vsyncpa [#allocation5], 1 }

</bundles_post_ra>
